<compile_context>
chip_gen: v7x
topology: tpu7x:2x2x1
jax: 0.10.0
libtpu: 0.0.40
codegen_flags: <defaults>
</compile_context>

<pallas_src>
import functools

import jax
import jax.numpy as jnp
from jax.experimental import pallas as pl
from jax.experimental.pallas import tpu as pltpu


def _round_up(x, m):
    return ((x + m - 1) // m) * m


def _vq_kernel(m_valid, x_ref, e_ref, esq_ref, q_ref, idx_ref, sse_ref, cnt_ref):
    x = x_ref[...].astype(jnp.float32)       # (tm, D)
    e = e_ref[...].astype(jnp.float32)       # (K, D)
    e_sq = esq_ref[...]                      # (1, K)  precomputed ||E||^2
    tm = x.shape[0]
    K = e.shape[0]

    # ||x - e||^2 argmin is invariant to the per-row ||x||^2 term, so only the
    # cross term (MXU) and ||e||^2 are needed for codeword selection.
    xe = jax.lax.dot_general(x, e, (((1,), (1,)), ((), ())),
                             preferred_element_type=jnp.float32)    # (tm, K)
    dist = e_sq - 2.0 * xe

    # argmin over the codebook axis, first index on ties (== torch.argmin)
    min_d = jnp.min(dist, axis=-1, keepdims=True)
    iota = jax.lax.broadcasted_iota(jnp.int32, (tm, K), 1)
    masked = jnp.where(dist <= min_d, iota, K)
    idx = jnp.min(masked, axis=-1, keepdims=True)                   # (tm, 1)
    onehot = (iota == idx).astype(jnp.float32)                      # (tm, K) — stays on-chip

    # gather the selected codewords via one-hot matmul (MXU)
    quant = jnp.dot(onehot, e, preferred_element_type=jnp.float32)  # (tm, D)

    q_ref[...] = quant.astype(q_ref.dtype)
    idx_ref[...] = idx

    diff = quant - x
    if m_valid is None:
        # no tail padding present at trace time: skip the mask entirely
        cnt_src = onehot
    else:
        i = pl.program_id(0)
        rows = i * tm + jax.lax.broadcasted_iota(jnp.int32, (tm, 1), 0)
        valid = (rows < m_valid).astype(jnp.float32)                # (tm, 1)
        diff = diff * valid
        cnt_src = onehot * valid

    # per-tile partial outputs (no grid-carried accumulator => grid is parallel)
    sse_ref[...] = jnp.sum(diff * diff, axis=0, keepdims=True)[None]   # (1, 1, D)
    cnt_ref[...] = jnp.sum(cnt_src, axis=0, keepdims=True)[None]       # (1, 1, K)


def quantizer_forward(inputs, embedding, commitment_cost=0.25, tm=1024):
    """Forward pass of the VQ-VAE Quantizer.

    inputs:    (N, C, H, W) float32, NCHW, C == embedding_dim
    embedding: (num_embeddings, embedding_dim) float32 codebook
    returns:   loss, quantized (N, C, H, W), perplexity, encodings (M, K)
    """
    N, C, H, W = inputs.shape
    K, D = embedding.shape
    assert C == D, "channel dim must equal embedding_dim"

    # NCHW -> NHWC -> (M, D)   (layout glue stays in XLA)
    flat = jnp.transpose(inputs, (0, 2, 3, 1)).reshape(-1, D).astype(jnp.float32)
    M = flat.shape[0]

    # large row tiles; pad the row axis instead of asserting divisibility
    tm = _round_up(max(int(tm), 128), 128)
    tm = min(tm, _round_up(M, 128))
    m_pad = _round_up(M, tm)
    num_tiles = m_pad // tm

    flat_p = flat if m_pad == M else jnp.pad(flat, ((0, m_pad - M), (0, 0)))

    emb = embedding.astype(jnp.float32)
    e_sq = jnp.sum(emb * emb, axis=1)[None, :]          # (1, K), hoisted out of the kernel

    kernel = functools.partial(_vq_kernel, M if m_pad != M else None)

    out_shapes = (
        jax.ShapeDtypeStruct((m_pad, D), jnp.float32),        # quantized rows
        jax.ShapeDtypeStruct((m_pad, 1), jnp.int32),          # nearest-codeword index
        jax.ShapeDtypeStruct((num_tiles, 1, D), jnp.float32),  # per-tile SSE partials
        jax.ShapeDtypeStruct((num_tiles, 1, K), jnp.float32),  # per-tile usage counts
    )

    quant_p, idx_p, sse_p, cnt_p = pl.pallas_call(
        kernel,
        out_shape=out_shapes,
        grid_spec=pltpu.PrefetchScalarGridSpec(
            num_scalar_prefetch=0,
            grid=(num_tiles,),
            in_specs=[
                pl.BlockSpec((tm, D), lambda i: (i, 0)),   # input rows tile
                pl.BlockSpec((K, D), lambda i: (0, 0)),    # full codebook
                pl.BlockSpec((1, K), lambda i: (0, 0)),    # precomputed ||E||^2
            ],
            out_specs=[
                pl.BlockSpec((tm, D), lambda i: (i, 0)),
                pl.BlockSpec((tm, 1), lambda i: (i, 0)),
                pl.BlockSpec((1, 1, D), lambda i: (i, 0, 0)),
                pl.BlockSpec((1, 1, K), lambda i: (i, 0, 0)),
            ],
        ),
        compiler_params=pltpu.CompilerParams(
            dimension_semantics=("parallel",),
            vmem_limit_bytes=32 * 1024 * 1024),
    )(flat_p, emb, e_sq)

    quant_flat = quant_p[:M]
    indices = idx_p[:M, 0]

    sse = jnp.sum(sse_p)                 # scalar: sum of (quant - x)^2 over valid rows
    cnt = jnp.sum(cnt_p, axis=(0, 1))    # (K,) codeword usage counts

    # losses (forward values: e_latent and q_latent are the same MSE)
    mse = sse / (M * D)
    loss = mse + commitment_cost * mse

    # straight-through estimator (forward value == quantized)
    quant_flat_st = flat + jax.lax.stop_gradient(quant_flat - flat)
    quantized = jnp.transpose(quant_flat_st.reshape(N, H, W, D), (0, 3, 1, 2))

    # dense encodings only materialized here, outside the kernel's HBM traffic
    encodings = jax.nn.one_hot(indices, K, dtype=jnp.float32)

    avg_probs = cnt / M
    perplexity = jnp.exp(-jnp.sum(avg_probs * jnp.log(avg_probs + 1e-10)))

    return loss, quantized, perplexity, encodings


def _reference_forward(inputs, embedding, commitment_cost=0.25):
    """Pure-JAX reference of the standard VQ-VAE quantizer forward."""
    N, C, H, W = inputs.shape
    K, D = embedding.shape
    flat = jnp.transpose(inputs, (0, 2, 3, 1)).reshape(-1, D)
    dist = (jnp.sum(flat ** 2, axis=1, keepdims=True)
            - 2.0 * flat @ embedding.T
            + jnp.sum(embedding ** 2, axis=1)[None, :])
    idx = jnp.argmin(dist, axis=1)
    encodings = jax.nn.one_hot(idx, K, dtype=jnp.float32)
    quant_flat = encodings @ embedding
    mse = jnp.mean((quant_flat - flat) ** 2)
    loss = mse + commitment_cost * mse
    quantized = jnp.transpose(quant_flat.reshape(N, H, W, D), (0, 3, 1, 2))
    avg_probs = jnp.mean(encodings, axis=0)
    perplexity = jnp.exp(-jnp.sum(avg_probs * jnp.log(avg_probs + 1e-10)))
    return loss, quantized, perplexity, encodings


if __name__ == "__main__":
    # Small deterministic config consistent with the module:
    #   embedding_dim (C) = 32, num_embeddings (K) = 128, commitment_cost = 0.25
    # H = W = 12 gives M = 288 rows -> exercises the padded / multi-tile path.
    num_embeddings, embedding_dim, commitment_cost = 128, 32, 0.25
    N, H, W = 2, 12, 12

    key = jax.random.PRNGKey(0)
    k_x, k_e = jax.random.split(key)
    x = jax.random.normal(k_x, (N, embedding_dim, H, W), dtype=jnp.float32)
    # codebook init like nn.Embedding.weight.data.uniform_(-1/K, 1/K)
    embedding = jax.random.uniform(
        k_e, (num_embeddings, embedding_dim), dtype=jnp.float32,
        minval=-1.0 / num_embeddings, maxval=1.0 / num_embeddings)

    # small tile for the tiny demo shapes (default tm=1024 for real workloads)
    loss, quantized, perplexity, encodings = quantizer_forward(
        x, embedding, commitment_cost, tm=128)
    jax.block_until_ready((loss, quantized, perplexity, encodings))

    # correctness check against a pure-JAX reference
    ref_loss, ref_q, ref_p, ref_enc = _reference_forward(
        x, embedding, commitment_cost)
    assert jnp.allclose(loss, ref_loss, atol=1e-5, rtol=1e-5)
    assert jnp.allclose(quantized, ref_q, atol=1e-5, rtol=1e-5)
    assert jnp.allclose(perplexity, ref_p, atol=1e-4, rtol=1e-4)
    assert jnp.allclose(encodings, ref_enc)

    print("KERNEL_OK")
</pallas_src>

<mosaic_0001>
module attributes {stable_mosaic.version = 11 : i64} {
  func.func @_vq_kernel(%arg0: i32, %arg1: memref<128x32xf32, #tpu.memory_space<vmem>>, %arg2: memref<128x32xf32, #tpu.memory_space<vmem>>, %arg3: memref<1x128xf32, #tpu.memory_space<vmem>>, %arg4: memref<128x32xf32, #tpu.memory_space<vmem>>, %arg5: memref<128x1xi32, #tpu.memory_space<vmem>>, %arg6: memref<1x1x32xf32, #tpu.memory_space<vmem>>, %arg7: memref<1x1x128xf32, #tpu.memory_space<vmem>>) attributes {dimension_semantics = [#tpu.dimension_semantics<parallel>], iteration_bounds = array<i64: 3>, scalar_prefetch = 0 : i64, scratch_operands = 0 : i64, tpu.core_type = #tpu.core_type<tc>, window_params = [{transform_indices = @transform_0, window_bounds = array<i64: 128, 32>}, {pipeline_mode = #tpu.pipeline_mode<synchronous>, transform_indices = @transform_1, window_bounds = array<i64: 128, 32>}, {pipeline_mode = #tpu.pipeline_mode<synchronous>, transform_indices = @transform_2, window_bounds = array<i64: 1, 128>}, {transform_indices = @transform_3, window_bounds = array<i64: 128, 32>}, {transform_indices = @transform_4, window_bounds = array<i64: 128, 1>}, {transform_indices = @transform_5, window_bounds = array<i64: 1, 1, 32>}, {transform_indices = @transform_6, window_bounds = array<i64: 1, 1, 128>}]} {
    %c0 = arith.constant 0 : index
    %c0_0 = arith.constant 0 : index
    %0 = vector.load %arg1[%c0, %c0_0] : memref<128x32xf32, #tpu.memory_space<vmem>>, vector<128x32xf32>
    %c0_1 = arith.constant 0 : index
    %c0_2 = arith.constant 0 : index
    %1 = vector.load %arg2[%c0_1, %c0_2] : memref<128x32xf32, #tpu.memory_space<vmem>>, vector<128x32xf32>
    %c0_3 = arith.constant 0 : index
    %c0_4 = arith.constant 0 : index
    %2 = vector.load %arg3[%c0_3, %c0_4] : memref<1x128xf32, #tpu.memory_space<vmem>>, vector<1x128xf32>
    %cst = arith.constant dense<0.000000e+00> : vector<128x128xf32>
    %3 = tpu.matmul %0, %1, %cst {dimension_numbers = #tpu.dot_dimension_numbers<[1], [1], [0], [0], [0, 0, 1, 0], [], []>} : vector<128x32xf32>, vector<128x32xf32>, vector<128x128xf32> -> vector<128x128xf32>
    %cst_5 = arith.constant 2.000000e+00 : f32
    %4 = vector.broadcast %cst_5 : f32 to vector<128x128xf32>
    %5 = arith.mulf %4, %3 : vector<128x128xf32>
    %6 = vector.broadcast %2 : vector<1x128xf32> to vector<128x128xf32>
    %7 = arith.subf %6, %5 : vector<128x128xf32>
    %cst_6 = arith.constant dense<0x7F800000> : vector<128xf32>
    %8 = vector.multi_reduction <minimumf>, %7, %cst_6 [1] : vector<128x128xf32> to vector<128xf32>
    %9 = vector.shape_cast %8 : vector<128xf32> to vector<128x1xf32>
    %10 = tpu.iota {dimensions = array<i32: 1>} : vector<128x128xi32>
    %11 = vector.broadcast %9 : vector<128x1xf32> to vector<128x128xf32>
    %12 = arith.cmpf ole, %7, %11 : vector<128x128xf32>
    %c128_i32 = arith.constant 128 : i32
    %13 = vector.broadcast %c128_i32 : i32 to vector<128x128xi32>
    %14 = arith.select %12, %10, %13 : vector<128x128xi1>, vector<128x128xi32>
    %cst_7 = arith.constant dense<2147483647> : vector<128xi32>
    %15 = vector.multi_reduction <minsi>, %14, %cst_7 [1] : vector<128x128xi32> to vector<128xi32>
    %16 = vector.shape_cast %15 : vector<128xi32> to vector<128x1xi32>
    %17 = vector.broadcast %16 : vector<128x1xi32> to vector<128x128xi32>
    %18 = arith.cmpi eq, %10, %17 : vector<128x128xi32>
    %19 = arith.extui %18 : vector<128x128xi1> to vector<128x128xi32>
    %20 = arith.sitofp %19 : vector<128x128xi32> to vector<128x128xf32>
    %cst_8 = arith.constant dense<0.000000e+00> : vector<128x32xf32>
    %21 = tpu.matmul %20, %1, %cst_8 {dimension_numbers = #tpu.dot_dimension_numbers<[1], [0], [0], [1], [0, 0, 1, 1], [], []>} : vector<128x128xf32>, vector<128x32xf32>, vector<128x32xf32> -> vector<128x32xf32>
    %c0_9 = arith.constant 0 : index
    %c0_10 = arith.constant 0 : index
    %22 = vector.load %arg4[%c0_9, %c0_10] : memref<128x32xf32, #tpu.memory_space<vmem>>, vector<128x32xf32>
    tpu.vector_store %arg4[%c0_9, %c0_10], %21 {strides = array<i32>} : memref<128x32xf32, #tpu.memory_space<vmem>>, vector<128x32xf32>,
    %c0_11 = arith.constant 0 : index
    %c0_12 = arith.constant 0 : index
    %23 = vector.load %arg5[%c0_11, %c0_12] : memref<128x1xi32, #tpu.memory_space<vmem>>, vector<128x1xi32>
    tpu.vector_store %arg5[%c0_11, %c0_12], %16 {strides = array<i32>} : memref<128x1xi32, #tpu.memory_space<vmem>>, vector<128x1xi32>,
    %24 = arith.subf %21, %0 : vector<128x32xf32>
    %c128_i32_13 = arith.constant 128 : i32
    %25 = arith.muli %arg0, %c128_i32_13 : i32
    %26 = tpu.iota {dimensions = array<i32: 0>} : vector<128x1xi32>
    %27 = vector.broadcast %25 : i32 to vector<128x1xi32>
    %28 = arith.addi %27, %26 : vector<128x1xi32>
    %c288_i32 = arith.constant 288 : i32
    %29 = vector.broadcast %c288_i32 : i32 to vector<128x1xi32>
    %30 = arith.cmpi slt, %28, %29 : vector<128x1xi32>
    %31 = arith.extui %30 : vector<128x1xi1> to vector<128x1xi32>
    %32 = arith.sitofp %31 : vector<128x1xi32> to vector<128x1xf32>
    %33 = vector.broadcast %32 : vector<128x1xf32> to vector<128x32xf32>
    %34 = arith.mulf %24, %33 : vector<128x32xf32>
    %35 = vector.broadcast %32 : vector<128x1xf32> to vector<128x128xf32>
    %36 = arith.mulf %20, %35 : vector<128x128xf32>
    %37 = arith.mulf %34, %34 : vector<128x32xf32>
    %cst_14 = arith.constant dense<0.000000e+00> : vector<32xf32>
    %38 = vector.multi_reduction <add>, %37, %cst_14 [0] : vector<128x32xf32> to vector<32xf32>
    %39 = vector.shape_cast %38 : vector<32xf32> to vector<1x32xf32>
    %40 = vector.shape_cast %39 : vector<1x32xf32> to vector<1x1x32xf32>
    %c0_15 = arith.constant 0 : index
    %c0_16 = arith.constant 0 : index
    %c0_17 = arith.constant 0 : index
    %41 = vector.load %arg6[%c0_15, %c0_16, %c0_17] : memref<1x1x32xf32, #tpu.memory_space<vmem>>, vector<1x1x32xf32>
    tpu.vector_store %arg6[%c0_15, %c0_16, %c0_17], %40 {strides = array<i32>} : memref<1x1x32xf32, #tpu.memory_space<vmem>>, vector<1x1x32xf32>,
    %cst_18 = arith.constant dense<0.000000e+00> : vector<128xf32>
    %42 = vector.multi_reduction <add>, %36, %cst_18 [0] : vector<128x128xf32> to vector<128xf32>
    %43 = vector.shape_cast %42 : vector<128xf32> to vector<1x128xf32>
    %44 = vector.shape_cast %43 : vector<1x128xf32> to vector<1x1x128xf32>
    %c0_19 = arith.constant 0 : index
    %c0_20 = arith.constant 0 : index
    %c0_21 = arith.constant 0 : index
    %45 = vector.load %arg7[%c0_19, %c0_20, %c0_21] : memref<1x1x128xf32, #tpu.memory_space<vmem>>, vector<1x1x128xf32>
    tpu.vector_store %arg7[%c0_19, %c0_20, %c0_21], %44 {strides = array<i32>} : memref<1x1x128xf32, #tpu.memory_space<vmem>>, vector<1x1x128xf32>,
    return
  }
  func.func @transform_0(%arg0: i32) -> (i32, i32) {
    %c0_i32 = arith.constant 0 : i32
    %c0_i32_0 = arith.constant 0 : i32
    return %arg0, %c0_i32 : i32, i32
  }
  func.func @transform_1(%arg0: i32) -> (i32, i32) {
    %c0_i32 = arith.constant 0 : i32
    %c0_i32_0 = arith.constant 0 : i32
    %c0_i32_1 = arith.constant 0 : i32
    return %c0_i32, %c0_i32_0 : i32, i32
  }
  func.func @transform_2(%arg0: i32) -> (i32, i32) {
    %c0_i32 = arith.constant 0 : i32
    %c0_i32_0 = arith.constant 0 : i32
    %c0_i32_1 = arith.constant 0 : i32
    return %c0_i32, %c0_i32_0 : i32, i32
  }
  func.func @transform_3(%arg0: i32) -> (i32, i32) {
    %c0_i32 = arith.constant 0 : i32
    %c0_i32_0 = arith.constant 0 : i32
    return %arg0, %c0_i32 : i32, i32
  }
  func.func @transform_4(%arg0: i32) -> (i32, i32) {
    %c0_i32 = arith.constant 0 : i32
    %c0_i32_0 = arith.constant 0 : i32
    return %arg0, %c0_i32 : i32, i32
  }
  func.func @transform_5(%arg0: i32) -> (i32, i32, i32) {
    %c0_i32 = arith.constant 0 : i32
    %c0_i32_0 = arith.constant 0 : i32
    %c0_i32_1 = arith.constant 0 : i32
    return %arg0, %c0_i32, %c0_i32_0 : i32, i32, i32
  }
  func.func @transform_6(%arg0: i32) -> (i32, i32, i32) {
    %c0_i32 = arith.constant 0 : i32
    %c0_i32_0 = arith.constant 0 : i32
    %c0_i32_1 = arith.constant 0 : i32
    return %arg0, %c0_i32, %c0_i32_0 : i32, i32, i32
  }
}

</mosaic_0001>

<bundles_post_ra>
// kernel: tpu_custom_call.1
= control target key start
LH: loop header
LB: loop body
LE: loop exit
PB: predicated region body
PF: predicated region fallthrough
CT: control target
= control target key end

     0   :  { %12 = vsyncpa [#allocation3], 0  ;;  %s2920_s0 = inlined_call_operand.vmem [shape: f32[384,32], index: 0, kind: input, shape index: {}]   ;;  %s2921_s1 = inlined_call_operand.vmem [shape: f32[128,32], index: 1, kind: input, shape index: {}]   ;;  %s2922_s2 = inlined_call_operand.vmem [shape: f32[1,128], index: 2, kind: input, shape index: {}]   ;;  %s2923_s3 = inlined_call_operand.vmem [shape: f32[384,32], index: 3, kind: output, shape index: {0}]   ;;  %s2924_s4 = inlined_call_operand.vmem [shape: s32[384,1], index: 4, kind: output, shape index: {1}]   ;;  %s2925_s5 = inlined_call_operand.hbm [shape: f32[3,1,32], index: 5, kind: output, shape index: {2}]   ;;  %s2926_s6 = inlined_call_operand.hbm [shape: f32[3,1,128], index: 6, kind: output, shape index: {3}]  }
   0x1   :  { %14 = vsyncpa [#allocation3 + $0x1], 0 }
   0x2   :  { %15 = vsyncpa [#allocation5], 0 }
   0x3   :  { %17 = vsyncpa [#allocation5 + $0x1], 0  ;;  %s2054_s21 = smov 0   ;;  %s2056_s22 = smov 0  }
   0x4   :  { %s2058_s23 = smov 0   ;;  %s2060_s24 = smov 0  }
   0x5 LB: > { %s2075_s25 = sadd.s32 4294967295, %s2013_s24   ;;  %s1505_s26 = sadd.s32 4294967294, %s2013_s24   ;;  %s2013_s24 = sphi %s2060_s24, %s2934_s24   ;;  %s2009_s23 = sphi %s2058_s23, %s2933_s23   ;;  %s2005_s22 = sphi %s2056_s22, %s2932_s22   ;;  %s2001_s21 = sphi %s2054_s21, %s2931_s21  }
   0x6   : > { %s2079_s27 = sadd.s32 1, %s2013_s24   ;;  %s150_s28 = sadd.s32 1, %s2009_s23 }
   0x7   : > { %s147_s29 = ssub.s32 %s2013_s24, %s2079_s27  ;;  %p160_p0 = scmp.ne.s32.totalorder %s2009_s23, %s2005_s22 }
   0x8   : > { %p148_p1 = scmp.eq.s32.totalorder %s147_s29, 0  ;;  %p161_p2 = scmp.eq.s32.totalorder %s2075_s25, 2 }
   0x9   : > { %p166_p3 = scmp.ne.s32.totalorder %s2005_s22, %s2001_s21  ;;  %p167_p4 = scmp.eq.s32.totalorder %s1505_s26, 2 }
   0xa   : > { %s2090_s30 = scalar_select %p148_p1, %s2009_s23, %s150_s28  }
   0xb   : > { %p2092_p5 = por %p161_p2, %p160_p0  ;;  %p2096_p6 = por %p167_p4, %p166_p3 }
   0xc   : > { %p1508_p7 = scmp.ge.s32.totalorder %s2013_s24, 1  ;;  %p226_p8 = scmp.lt.s32.totalorder %s2013_s24, 4 }
   0xe   : > { %p227_p9 = pnand %p1508_p7, %p226_p8 }
   0xf   : > { %v303_v0 = vld [vmem:[%s2921_s1] sm:$0xff] (!%p227_p9)  ;;  %v304_v1 = vld [vmem:[%s2921_s1 + $0x8] sm:$0xff] (!%p227_p9)  ;;  %vm320_vm0 = vcmask (!%p227_p9), 261120   ;;  %v305_v2 = vld [vmem:[%s2921_s1 + $0x10] sm:$0xff] (!%p227_p9)  ;;  %s2112_s15 = sshll.u32 (!%p227_p9), %s2075_s25, 4  ;;  %s1580_s9 = sshll.u32 (!%p227_p9), %s2075_s25, 7 }
  0x10   : > { %230 = sbr.rel (%p227_p9) target bundleno = 1020 (0x3fc), region = 32  ;;  %v1777_v3 = vpack.c.bf16 (!%p227_p9), %v304_v1, %v303_v0  ;;  %vm2116_vm1 = vmpackc.low (!%p227_p9), %vm320_vm0, %vm320_vm0  ;;  %v306_v5 = vld [vmem:[%s2921_s1 + $0x18] sm:$0xff] (!%p227_p9)  ;;  %p270_p10 = scmp.lt.s32.totalorder (!%p227_p9), %s2112_s15, 47  ;;  %v307_v7 = vld [vmem:[%s2921_s1 + $0x20] sm:$0xff] (!%p227_p9) }
  0x11   : > { %v1783_v6 = vpack.c.bf16 (!%p227_p9), %v306_v5, %v305_v2  ;;  %v308_v8 = vld [vmem:[%s2921_s1 + $0x28] sm:$0xff] (!%p227_p9)  ;;  %v309_v11 = vld [vmem:[%s2921_s1 + $0x30] sm:$0xff] (!%p227_p9)  ;;  %v310_v12 = vld [vmem:[%s2921_s1 + $0x38] sm:$0xff] (!%p227_p9)  ;;  %s2759_s13 = sand.u32 (!%p227_p9), 1, %s2005_s22   ;;  %s2017_s28 = smov (!%p227_p9), [#allocation4]  }
  0x12   : > { %1779 = vmatprep.subr.msk.bf16.mxu0 (!%p227_p9), %vm2116_vm1, %v1777_v3  ;;  %1826 = vmatprep.subr.bf16.mxu1 (!%p227_p9), %v1777_v3  ;;  %v1789_v9 = vpack.c.bf16 (!%p227_p9), %v308_v8, %v307_v7  ;;  %v1795_v13 = vpack.c.bf16 (!%p227_p9), %v310_v12, %v309_v11  ;;  %v311_v14 = vld [vmem:[%s2921_s1 + $0x40] sm:$0xff] (!%p227_p9)  ;;  %v312_v15 = vld [vmem:[%s2921_s1 + $0x48] sm:$0xff] (!%p227_p9)  ;;  %v313_v17 = vld [vmem:[%s2921_s1 + $0x50] sm:$0xff] (!%p227_p9)  ;;  %s268_s14 = scalar_lea.vmem (!%p227_p9), [#allocation4], %s2759_s13  ;;  %s1339_s20 = scalar_lea.sflag (!%p227_p9), [#allocation5], %s2759_s13 }
  0x13   : > { %1782 = vmatpush3.bf16.xpose.msk.msra.mxu0 (!%p227_p9), %vm2116_vm1, %v1777_v3  ;;  %1828 = vmatpush3.bf16.msra.mxu1 (!%p227_p9), %v1777_v3  ;;  %v1801_v16 = vpack.c.bf16 (!%p227_p9), %v312_v15, %v311_v14  ;;  %v314_v18 = vld [vmem:[%s2921_s1 + $0x58] sm:$0xff] (!%p227_p9)  ;;  %v315_v20 = vld [vmem:[%s2921_s1 + $0x60] sm:$0xff] (!%p227_p9)  ;;  %v316_v21 = vld [vmem:[%s2921_s1 + $0x68] sm:$0xff] (!%p227_p9)  ;;  %s1372_s19 = sshll.u32 (!%p227_p9), %s268_s14, 4  ;;  %s1373_s19 = int_to_ptr.vmem [resolvable:$true] %s1372_s19 }
  0x14   : > { %1785 = vmatprep.subr.msk.bf16.mxu0 (!%p227_p9), %vm2116_vm1, %v1783_v6  ;;  %1830 = vmatprep.subr.bf16.mxu1 (!%p227_p9), %v1783_v6  ;;  %v1807_v19 = vpack.c.bf16 (!%p227_p9), %v314_v18, %v313_v17  ;;  %v1813_v22 = vpack.c.bf16 (!%p227_p9), %v316_v21, %v315_v20  ;;  %v317_v23 = vld [vmem:[%s2921_s1 + $0x70] sm:$0xff] (!%p227_p9)  ;;  %v318_v24 = vld [vmem:[%s2921_s1 + $0x78] sm:$0xff] (!%p227_p9)  ;;  %v1547_v43 = vld [vmem:[%s2922_s2] ss:$0 sm:$0xff] (!%p227_p9)  ;;  %s1919_s26 = scalar_lea.vmem (!%p227_p9), %s1373_s19, 16 }
  0x15   : > { %v1819_v25 = vpack.c.bf16 (!%p227_p9), %v318_v24, %v317_v23  ;;  %p1920_p11 = scmp.ne.s32.totalorder (!%p227_p9), %s1373_s19, %s1919_s26 }
  0x17   : > { %s271_s18 = scalar_select %p270_p10, %s2112_s15, 47  ;;  %1832 = vmatpush3.bf16.msra.mxu1 %v1783_v6 }
  0x18   : > { %1834 = vmatprep.subr.bf16.mxu1 %v1789_v9  ;;  %p1921_p12 = pnand %p1920_p11, %p2092_p5 }
  0x19   : > { %s2137_s29 = sshll.u32 %s271_s18, 3  ;;  %s2766_s18 = scalar_lea.hbm %s2926_s6, %s2112_s15 }
  0x1a   : > { %s2143_s11 = scalar_lea.vmem %s2920_s0, %s2137_s29  ;;  %s2560_s12 = scalar_lea.vmem %s2924_s4, %s2137_s29 }
  0x1b   : > { %v287_v10 = vld [vmem:[%s2143_s11] sm:$0xff]  ;;  %1788 = vmatpush3.bf16.xpose.msk.msra.mxu0 %vm2116_vm1, %v1783_v6  ;;  %1836 = vmatpush3.bf16.msra.mxu1 %v1789_v9  ;;  %v288_v26 = vld [vmem:[%s2143_s11 + $0x8] sm:$0xff]  ;;  %v289_v27 = vld [vmem:[%s2143_s11 + $0x10] sm:$0xff]  ;;  %p1922_p13 = pneg %p1921_p12 }
  0x1c   : > { %1697 = vmatprep.mubr.msk.f32.mxu0 %vm320_vm0, %v287_v10  ;;  %1791 = vmatprep.subr.msk.bf16.mxu0 %vm2116_vm1, %v1789_v9  ;;  %v290_v28 = vld [vmem:[%s2143_s11 + $0x18] sm:$0xff]  ;;  %v291_v29 = vld [vmem:[%s2143_s11 + $0x20] sm:$0xff]  ;;  %v292_v30 = vld [vmem:[%s2143_s11 + $0x28] sm:$0xff] }
  0x1d   : > { %1838 = vmatprep.subr.bf16.mxu1 %v1795_v13  ;;  %v293_v31 = vld [vmem:[%s2143_s11 + $0x30] sm:$0xff]  ;;  %v294_v32 = vld [vmem:[%s2143_s11 + $0x38] sm:$0xff]  ;;  %v295_v33 = vld [vmem:[%s2143_s11 + $0x40] sm:$0xff] }
  0x1e   : > { %v296_v34 = vld [vmem:[%s2143_s11 + $0x48] sm:$0xff]  ;;  %v297_v35 = vld [vmem:[%s2143_s11 + $0x50] sm:$0xff]  ;;  %v298_v36 = vld [vmem:[%s2143_s11 + $0x58] sm:$0xff] }
  0x1f   : > { %1840 = vmatpush3.bf16.msra.mxu1 %v1795_v13  ;;  %v299_v37 = vld [vmem:[%s2143_s11 + $0x60] sm:$0xff]  ;;  %v300_v38 = vld [vmem:[%s2143_s11 + $0x68] sm:$0xff]  ;;  %v301_v39 = vld [vmem:[%s2143_s11 + $0x70] sm:$0xff] }
  0x20   : > { %1842 = vmatprep.subr.bf16.mxu1 %v1801_v16  ;;  %v302_v40 = vld [vmem:[%s2143_s11 + $0x78] sm:$0xff] }
  0x23   : > { %1794 = vmatpush3.bf16.xpose.msk.msra.mxu0 %vm2116_vm1, %v1789_v9  ;;  %1844 = vmatpush3.bf16.msra.mxu1 %v1801_v16 }
  0x24   : > { %1797 = vmatprep.subr.msk.bf16.mxu0 %vm2116_vm1, %v1795_v13  ;;  %1846 = vmatprep.subr.bf16.mxu1 %v1807_v19 }
  0x27   : > { %1848 = vmatpush3.bf16.msra.mxu1 %v1807_v19 }
  0x28   : > { %1850 = vmatprep.subr.bf16.mxu1 %v1813_v22 }
  0x2b   : > { %1800 = vmatpush3.bf16.xpose.msk.msra.mxu0 %vm2116_vm1, %v1795_v13  ;;  %1852 = vmatpush3.bf16.msra.mxu1 %v1813_v22 }
  0x2c   : > { %1803 = vmatprep.subr.msk.bf16.mxu0 %vm2116_vm1, %v1801_v16  ;;  %1854 = vmatprep.subr.bf16.mxu1 %v1819_v25 }
  0x2f   : > { %1856 = vmatpush3.bf16.msra.mxu1 %v1819_v25 }
  0x33   : > { %1806 = vmatpush3.bf16.xpose.msk.msra.mxu0 %vm2116_vm1, %v1801_v16 }
  0x34   : > { %1809 = vmatprep.subr.msk.bf16.mxu0 %vm2116_vm1, %v1807_v19 }
  0x3b   : > { %1812 = vmatpush3.bf16.xpose.msk.msra.mxu0 %vm2116_vm1, %v1807_v19 }
  0x3c   : > { %1815 = vmatprep.subr.msk.bf16.mxu0 %vm2116_vm1, %v1813_v22 }
  0x43   : > { %1818 = vmatpush3.bf16.xpose.msk.msra.mxu0 %vm2116_vm1, %v1813_v22 }
  0x44   : > { %1821 = vmatprep.subr.msk.bf16.mxu0 %vm2116_vm1, %v1819_v25 }
  0x4b   : > { %1824 = vmatpush3.bf16.xpose.msk.msra.mxu0 %vm2116_vm1, %v1819_v25 }
  0x52   : > { %1698 = vmatmul.mubr.msk.f32.vlgmr.msra.gmra.mrb[0].mxu0 %vm320_vm0, %v288_v26  ;;  %v632_v26 = vlaneseq }
  0x53   : > { %1700 = vmatprep.mubr.msk.f32.mxu0 %vm320_vm0, %v289_v27 }
  0x54   : > { %v2285_v27 = vand.u32 127, %v632_v26 }
  0x56   : > { %1701 = vmatmul.mubr.msk.f32.gmra.mrb[2].mxu0 %vm320_vm0, %v290_v28 }
  0x57   : > { %1703 = vmatprep.mubr.msk.f32.mxu0 %vm320_vm0, %v291_v29 }
  0x5a   : > { %1704 = vmatmul.mubr.msk.f32.gmra.mrb[4].mxu0 %vm320_vm0, %v292_v30 }
  0x5b   : > { %1706 = vmatprep.mubr.msk.f32.mxu0 %vm320_vm0, %v293_v31 }
  0x5e   : > { %1707 = vmatmul.mubr.msk.f32.gmra.mrb[6].mxu0 %vm320_vm0, %v294_v32 }
  0x5f   : > { %1709 = vmatprep.mubr.msk.f32.mxu0 %vm320_vm0, %v295_v33 }
  0x62   : > { %1710 = vmatmul.mubr.msk.f32.gmra.mrb[8].mxu0 %vm320_vm0, %v296_v34 }
  0x63   : > { %1712 = vmatprep.mubr.msk.f32.mxu0 %vm320_vm0, %v297_v35 }
  0x66   : > { %1713 = vmatmul.mubr.msk.f32.gmra.mrb[10].mxu0 %vm320_vm0, %v298_v36 }
  0x67   : > { %1715 = vmatprep.mubr.msk.f32.mxu0 %vm320_vm0, %v299_v37 }
  0x6a   : > { %1716 = vmatmul.mubr.msk.f32.gmra.mrb[12].mxu0 %vm320_vm0, %v300_v38 }
  0x6b   : > { %1718 = vmatprep.mubr.msk.f32.mxu0 %vm320_vm0, %v301_v39 }
  0x6e   : > { %1719 = vmatmul.mubr.msk.f32.gmra.mrb[14].mxu0 %vm320_vm0, %v302_v40 }
 0x125   : > { %v1699_v41 = vpop.f32.mrb[0].mxu0 }
 0x126   : > { %v483_v42 = vpop.f32.mrb[1].mxu0  ;;  %v563_v45 = vmul.f32 2.0, %v1699_v41 }
 0x127   : > { %v562_v44 = vmul.f32 2.0, %v483_v42 }
 0x128   : > { %v2239_v52 = vsub.f32 %v1547_v43, %v563_v45 }
 0x129   : > { %v1702_v46 = vpop.f32.mrb[2].mxu0  ;;  %v2236_v47 = vsub.f32 %v1547_v43, %v562_v44 }
 0x12a   : > { %v493_v48 = vpop.f32.mrb[3].mxu0  ;;  %v565_v50 = vmul.f32 2.0, %v1702_v46 }
 0x12b   : > { %v564_v49 = vmul.f32 2.0, %v493_v48  ;;  %600 = vmin.xlane.f32.xlu0 %v2236_v47 }
 0x12c   : > { %v2245_v58 = vsub.f32 %v1547_v43, %v565_v50 }
 0x12d   : > { %v1705_v51 = vpop.f32.mrb[4].mxu0  ;;  %v2241_v53 = vsub.f32 %v1547_v43, %v564_v49 }
 0x12e   : > { %v503_v54 = vpop.f32.mrb[5].mxu0  ;;  %v567_v56 = vmul.f32 2.0, %v1705_v51 }
 0x12f   : > { %v566_v55 = vmul.f32 2.0, %v503_v54  ;;  %602 = vmin.xlane.f32.xlu0 %v2239_v52  ;;  %604 = vmin.xlane.f32.xlu1 %v2241_v53 }
 0x130   : > { %v2251_v0 = vsub.f32 %v1547_v43, %v567_v56 }
 0x131   : > { %v1708_v57 = vpop.f32.mrb[6].mxu0  ;;  %v2247_v59 = vsub.f32 %v1547_v43, %v566_v55 }
 0x132   : > { %v513_v60 = vpop.f32.mrb[7].mxu0  ;;  %v569_v62 = vmul.f32 2.0, %v1708_v57 }
 0x133   : > { %v568_v61 = vmul.f32 2.0, %v513_v60  ;;  %606 = vmin.xlane.f32.xlu1 %v2245_v58  ;;  %608 = vmin.xlane.f32.xlu0 %v2247_v59 }
 0x134   : > { %v2257_v6 = vsub.f32 %v1547_v43, %v569_v62 }
 0x135   : > { %v1711_v63 = vpop.f32.mrb[8].mxu0  ;;  %v2253_v1 = vsub.f32 %v1547_v43, %v568_v61 }
 0x136   : > { %v523_v2 = vpop.f32.mrb[9].mxu0  ;;  %v571_v4 = vmul.f32 2.0, %v1711_v63 }
 0x137   : > { %v570_v3 = vmul.f32 2.0, %v523_v2  ;;  %610 = vmin.xlane.f32.xlu1 %v2251_v0  ;;  %612 = vmin.xlane.f32.xlu0 %v2253_v1 }
 0x138   : > { %v2263_v12 = vsub.f32 %v1547_v43, %v571_v4 }
 0x139   : > { %v1714_v5 = vpop.f32.mrb[10].mxu0  ;;  %v2259_v7 = vsub.f32 %v1547_v43, %v570_v3 }
 0x13a   : > { %v533_v8 = vpop.f32.mrb[11].mxu0  ;;  %v573_v10 = vmul.f32 2.0, %v1714_v5 }
 0x13b   : > { %v572_v9 = vmul.f32 2.0, %v533_v8  ;;  %614 = vmin.xlane.f32.xlu1 %v2257_v6  ;;  %616 = vmin.xlane.f32.xlu0 %v2259_v7 }
 0x13c   : > { %v2269_v18 = vsub.f32 %v1547_v43, %v573_v10 }
 0x13d   : > { %v1717_v11 = vpop.f32.mrb[12].mxu0  ;;  %v2265_v13 = vsub.f32 %v1547_v43, %v572_v9 }
 0x13e   : > { %v543_v14 = vpop.f32.mrb[13].mxu0  ;;  %v575_v16 = vmul.f32 2.0, %v1717_v11 }
 0x13f   : > { %v574_v15 = vmul.f32 2.0, %v543_v14  ;;  %618 = vmin.xlane.f32.xlu1 %v2263_v12  ;;  %620 = vmin.xlane.f32.xlu0 %v2265_v13 }
 0x140   : > { %v2275_v23 = vsub.f32 %v1547_v43, %v575_v16 }
 0x141   : > { %v1720_v17 = vpop.f32.mrb[14].mxu0  ;;  %v2271_v19 = vsub.f32 %v1547_v43, %v574_v15 }
 0x142   : > { %v553_v20 = vpop.f32.mrb[15].mxu0  ;;  %v577_v22 = vmul.f32 2.0, %v1720_v17 }
 0x143   : > { %v576_v21 = vmul.f32 2.0, %v553_v20  ;;  %622 = vmin.xlane.f32.xlu1 %v2269_v18  ;;  %624 = vmin.xlane.f32.xlu0 %v2271_v19 }
 0x144   : > { %v2281_v25 = vsub.f32 %v1547_v43, %v577_v22 }
 0x145   : > { %v2277_v24 = vsub.f32 %v1547_v43, %v576_v21 }
 0x147   : > { %626 = vmin.xlane.f32.xlu1 %v2275_v23  ;;  %628 = vmin.xlane.f32.xlu0 %v2277_v24 }
 0x14b   : > { %630 = vmin.xlane.f32.xlu1 %v2281_v25 }
 0x1b8   : > { %v601_v28 = vpop.xlane.xlu0 %600 }
 0x1b9   : > { %vm634_vm2 = vcmp.le.f32.partialorder %v2236_v47, %v601_v28 }
 0x1ba   : > { %v2289_v29 = vsel %vm634_vm2, %v2285_v27, 128 }
 0x1bb   : > { %v667_v30 = vshra.s32 %v2289_v29, 16 }
 0x1bc   : > { %v603_v31 = vpop.xlane.xlu0 %602  ;;  %v605_v32 = vpop.xlane.xlu1 %604 }
 0x1bd   : > { %vm635_vm3 = vcmp.le.f32.partialorder %v2239_v52, %v603_v31  ;;  %vm636_vm4 = vcmp.le.f32.partialorder %v2241_v53, %v605_v32  ;;  %v2294_v33 = vcvt.s32.f32 %v667_v30  ;;  %v666_v32 = vand.u32 65535, %v2289_v29 }
 0x1be   : > { %v2297_v34 = vsel %vm635_vm3, %v2285_v27, 128  ;;  %v2300_v35 = vsel %vm636_vm4, %v2285_v27, 128 }
 0x1bf   : > { %670 = vmin.xlane.f32.xlu0 %v2294_v33  ;;  %v681_v36 = vshra.s32 %v2297_v34, 16  ;;  %v695_v37 = vshra.s32 %v2300_v35, 16 }
 0x1c0   : > { %v607_v38 = vpop.xlane.xlu1 %606  ;;  %v609_v39 = vpop.xlane.xlu0 %608 }
 0x1c1   : > { %vm637_vm5 = vcmp.le.f32.partialorder %v2245_v58, %v607_v38  ;;  %vm638_vm6 = vcmp.le.f32.partialorder %v2247_v59, %v609_v39  ;;  %v2307_v40 = vcvt.s32.f32 %v681_v36  ;;  %v2309_v41 = vcvt.s32.f32 %v695_v37 }
 0x1c2   : > { %v2312_v42 = vsel %vm637_vm5, %v2285_v27, 128  ;;  %v2315_v43 = vsel %vm638_vm6, %v2285_v27, 128  ;;  %v694_v36 = vand.u32 65535, %v2300_v35  ;;  %v668_v38 = vcvt.s32.f32 %v666_v32 }
 0x1c3   : > { %684 = vmin.xlane.f32.xlu1 %v2307_v40  ;;  %698 = vmin.xlane.f32.xlu0 %v2309_v41  ;;  %v709_v44 = vshra.s32 %v2312_v42, 16  ;;  %v723_v45 = vshra.s32 %v2315_v43, 16 }
 0x1c4   : > { %v611_v46 = vpop.xlane.xlu1 %610  ;;  %v613_v47 = vpop.xlane.xlu0 %612 }
 0x1c5   : > { %vm639_vm7 = vcmp.le.f32.partialorder %v2251_v0, %v611_v46  ;;  %vm640_vm8 = vcmp.le.f32.partialorder %v2253_v1, %v613_v47  ;;  %v2323_v48 = vcvt.s32.f32 %v709_v44  ;;  %v2325_v49 = vcvt.s32.f32 %v723_v45 }
 0x1c6   : > { %v2328_v50 = vsel %vm639_vm7, %v2285_v27, 128  ;;  %v2331_v51 = vsel %vm640_vm8, %v2285_v27, 128  ;;  %v708_v44 = vand.u32 65535, %v2312_v42  ;;  %v722_v45 = vand.u32 65535, %v2315_v43 }
 0x1c7   : > { %712 = vmin.xlane.f32.xlu1 %v2323_v48  ;;  %726 = vmin.xlane.f32.xlu0 %v2325_v49  ;;  %v737_v52 = vshra.s32 %v2328_v50, 16  ;;  %v751_v53 = vshra.s32 %v2331_v51, 16  ;;  %v736_v42 = vand.u32 65535, %v2328_v50  ;;  %v750_v43 = vand.u32 65535, %v2331_v51 }
 0x1c8   : > { %v615_v54 = vpop.xlane.xlu1 %614  ;;  %v617_v55 = vpop.xlane.xlu0 %616 }
 0x1c9   : > { %vm641_vm9 = vcmp.le.f32.partialorder %v2257_v6, %v615_v54  ;;  %vm642_vm10 = vcmp.le.f32.partialorder %v2259_v7, %v617_v55  ;;  %v2339_v56 = vcvt.s32.f32 %v737_v52  ;;  %v2341_v57 = vcvt.s32.f32 %v751_v53 }
 0x1ca   : > { %v2344_v58 = vsel %vm641_vm9, %v2285_v27, 128  ;;  %v2347_v59 = vsel %vm642_vm10, %v2285_v27, 128  ;;  %v710_v54 = vcvt.s32.f32 %v708_v44  ;;  %v724_v55 = vcvt.s32.f32 %v722_v45 }
 0x1cb   : > { %740 = vmin.xlane.f32.xlu1 %v2339_v56  ;;  %754 = vmin.xlane.f32.xlu0 %v2341_v57  ;;  %v765_v60 = vshra.s32 %v2344_v58, 16  ;;  %v779_v61 = vshra.s32 %v2347_v59, 16  ;;  %v764_v50 = vand.u32 65535, %v2344_v58  ;;  %v778_v51 = vand.u32 65535, %v2347_v59 }
 0x1cc   : > { %v619_v62 = vpop.xlane.xlu1 %618  ;;  %v621_v63 = vpop.xlane.xlu0 %620 }
 0x1cd   : > { %vm643_vm11 = vcmp.le.f32.partialorder %v2263_v12, %v619_v62  ;;  %vm644_vm12 = vcmp.le.f32.partialorder %v2265_v13, %v621_v63  ;;  %v2355_v0 = vcvt.s32.f32 %v765_v60  ;;  %v2357_v1 = vcvt.s32.f32 %v779_v61 }
 0x1ce   : > { %v2360_v2 = vsel %vm643_vm11, %v2285_v27, 128  ;;  %v2363_v3 = vsel %vm644_vm12, %v2285_v27, 128  ;;  %v738_v62 = vcvt.s32.f32 %v736_v42  ;;  %v752_v63 = vcvt.s32.f32 %v750_v43 }
 0x1cf   : > { %768 = vmin.xlane.f32.xlu1 %v2355_v0  ;;  %782 = vmin.xlane.f32.xlu0 %v2357_v1  ;;  %v793_v4 = vshra.s32 %v2360_v2, 16  ;;  %v807_v5 = vshra.s32 %v2363_v3, 16  ;;  %v792_v58 = vand.u32 65535, %v2360_v2  ;;  %v806_v59 = vand.u32 65535, %v2363_v3 }
 0x1d0   : > { %v623_v6 = vpop.xlane.xlu1 %622  ;;  %v625_v7 = vpop.xlane.xlu0 %624 }
 0x1d1   : > { %vm645_vm13 = vcmp.le.f32.partialorder %v2269_v18, %v623_v6  ;;  %vm646_vm14 = vcmp.le.f32.partialorder %v2271_v19, %v625_v7  ;;  %v2371_v8 = vcvt.s32.f32 %v793_v4  ;;  %v2373_v9 = vcvt.s32.f32 %v807_v5 }
 0x1d2   : > { %v2376_v10 = vsel %vm645_vm13, %v2285_v27, 128  ;;  %v2379_v11 = vsel %vm646_vm14, %v2285_v27, 128  ;;  %v766_v6 = vcvt.s32.f32 %v764_v50  ;;  %v780_v7 = vcvt.s32.f32 %v778_v51 }
 0x1d3   : > { %796 = vmin.xlane.f32.xlu1 %v2371_v8  ;;  %810 = vmin.xlane.f32.xlu0 %v2373_v9  ;;  %v821_v12 = vshra.s32 %v2376_v10, 16  ;;  %v835_v13 = vshra.s32 %v2379_v11, 16  ;;  %v820_v2 = vand.u32 65535, %v2376_v10  ;;  %v834_v3 = vand.u32 65535, %v2379_v11 }
 0x1d4   : > { %v627_v14 = vpop.xlane.xlu1 %626  ;;  %v629_v15 = vpop.xlane.xlu0 %628 }
 0x1d5   : > { %vm647_vm15 = vcmp.le.f32.partialorder %v2275_v23, %v627_v14  ;;  %vm648_vm1 = vcmp.le.f32.partialorder %v2277_v24, %v629_v15  ;;  %v2387_v16 = vcvt.s32.f32 %v821_v12  ;;  %v2389_v17 = vcvt.s32.f32 %v835_v13 }
 0x1d6   : > { %v2392_v18 = vsel %vm647_vm15, %v2285_v27, 128  ;;  %v2395_v19 = vsel %vm648_vm1, %v2285_v27, 128  ;;  %v794_v14 = vcvt.s32.f32 %v792_v58  ;;  %v808_v15 = vcvt.s32.f32 %v806_v59 }
 0x1d7   : > { %824 = vmin.xlane.f32.xlu1 %v2387_v16  ;;  %838 = vmin.xlane.f32.xlu0 %v2389_v17  ;;  %v849_v20 = vshra.s32 %v2392_v18, 16  ;;  %v863_v21 = vshra.s32 %v2395_v19, 16  ;;  %v848_v10 = vand.u32 65535, %v2392_v18  ;;  %v862_v11 = vand.u32 65535, %v2395_v19 }
 0x1d8   : > { %v631_v22 = vpop.xlane.xlu1 %630 }
 0x1d9   : > { %vm649_vm2 = vcmp.le.f32.partialorder %v2281_v25, %v631_v22  ;;  %v2402_v23 = vcvt.s32.f32 %v849_v20  ;;  %v2404_v24 = vcvt.s32.f32 %v863_v21  ;;  %v680_v25 = vand.u32 65535, %v2297_v34 }
 0x1da   : > { %v2407_v28 = vsel %vm649_vm2, %v2285_v27, 128  ;;  %v696_v34 = vcvt.s32.f32 %v694_v36  ;;  %v822_v22 = vcvt.s32.f32 %v820_v2  ;;  %v864_v36 = vcvt.s32.f32 %v862_v11 }
 0x1db   : > { %852 = vmin.xlane.f32.xlu1 %v2402_v23  ;;  %866 = vmin.xlane.f32.xlu0 %v2404_v24  ;;  %v877_v30 = vshra.s32 %v2407_v28, 16  ;;  %v682_v29 = vcvt.s32.f32 %v680_v25  ;;  %v876_v18 = vand.u32 65535, %v2407_v28  ;;  %v850_v25 = vcvt.s32.f32 %v848_v10 }
 0x1dd   : > { %v2412_v31 = vcvt.s32.f32 %v877_v30  ;;  %v836_v30 = vcvt.s32.f32 %v834_v3  ;;  %v878_v28 = vcvt.s32.f32 %v876_v18 }
 0x1df   : > { %880 = vmin.xlane.f32.xlu1 %v2412_v31 }
 0x24c   : > { %v2418_v37 = vpop.xlane.xlu0 %670 }
 0x24d   : > { %vm672_vm3 = vcmp.eq.f32.partialorder %v2294_v33, %v2418_v37  ;;  %v677_v44 = vcvt.f32.s32 %v2418_v37 }
 0x24e   : > { %v673_v39 = vsel %vm672_vm3, %v668_v38, inf }
 0x24f   : > { %674 = vmin.xlane.f32.xlu0 %v673_v39 }
 0x250   : > { %v2424_v46 = vpop.xlane.xlu1 %684  ;;  %v2426_v47 = vpop.xlane.xlu0 %698 }
 0x251   : > { %vm686_vm4 = vcmp.eq.f32.partialorder %v2307_v40, %v2424_v46  ;;  %vm700_vm5 = vcmp.eq.f32.partialorder %v2309_v41, %v2426_v47  ;;  %v705_v45 = vcvt.f32.s32 %v2426_v47 }
 0x252   : > { %v687_v35 = vsel %vm686_vm4, %v682_v29, inf  ;;  %v701_v33 = vsel %vm700_vm5, %v696_v34, inf  ;;  %v2502_v34 = vshrl.u32 %v632_v26, 7  ;;  %vm1099_vm4 = vcmask 7168  }
 0x253   : > { %688 = vmin.xlane.f32.xlu1 %v687_v35  ;;  %702 = vmin.xlane.f32.xlu0 %v701_v33  ;;  %v2506_v33 = vstv %s1580_s9  ;;  %v2512_v47 = vshll.u32 %v705_v45, 16  ;;  %s1923_s9 = sshll.u32 %s2017_s28, 4  ;;  %s1924_s9 = int_to_ptr.vmem [resolvable:$false] %s1923_s9 }
 0x254   : > { %v2434_v52 = vpop.xlane.xlu1 %712  ;;  %v2436_v53 = vpop.xlane.xlu0 %726  ;;  %v1135_v37 = vadd.s32 8, %v2502_v34  ;;  %v1139_v59 = vadd.s32 40, %v2502_v34  ;;  %v1141_v2 = vadd.s32 56, %v2502_v34  ;;  %s1925_s25 = scalar_lea.vmem %s1924_s9, 32  ;;  %p1926_p0 = scmp.lt.s32.totalorder %s1373_s19, %s1924_s9 }
 0x255   : > { %vm714_vm6 = vcmp.eq.f32.partialorder %v2323_v48, %v2434_v52  ;;  %vm728_vm7 = vcmp.eq.f32.partialorder %v2325_v49, %v2436_v53  ;;  %v733_v29 = vcvt.f32.s32 %v2436_v53  ;;  %p1927_p1 = scmp.lt.s32.totalorder %s1925_s25, %s1919_s26 }
 0x256   : > { %v715_v40 = vsel %vm714_vm6, %v710_v54, inf  ;;  %v729_v41 = vsel %vm728_vm7, %v724_v55, inf  ;;  %v1151_v54 = vadd.s32 %v2506_v33, %v2502_v34  ;;  %v1137_v55 = vadd.s32 24, %v2502_v34 }
 0x257   : > { %716 = vmin.xlane.f32.xlu1 %v715_v40  ;;  %730 = vmin.xlane.f32.xlu0 %v729_v41  ;;  %v2517_v26 = vshll.u32 %v733_v29, 16  ;;  %v1156_v11 = vadd.s32 %v2506_v33, %v1139_v59  ;;  %p1928_p2 = por %p1927_p1, %p1926_p0 }
 0x258   : > { %v2444_v60 = vpop.xlane.xlu1 %740  ;;  %v2446_v61 = vpop.xlane.xlu0 %754  ;;  %vm1167_vm5 = vcmp.lt.s32.totalorder %v1151_v54, 288  ;;  %v1154_v58 = vadd.s32 %v2506_v33, %v1137_v55 }
 0x259   : > { %vm742_vm8 = vcmp.eq.f32.partialorder %v2339_v56, %v2444_v60  ;;  %vm756_vm9 = vcmp.eq.f32.partialorder %v2341_v57, %v2446_v61  ;;  %v747_v35 = vcvt.f32.s32 %v2444_v60  ;;  %v1152_v60 = vadd.s32 %v2506_v33, %v1135_v37  ;;  %p1929_p3 = pnand %p1928_p2, %p1922_p13 }
 0x25a   : > { %v743_v48 = vsel %vm742_vm8, %v738_v62, inf  ;;  %v757_v49 = vsel %vm756_vm9, %v752_v63, inf  ;;  %v1138_v62 = vadd.s32 32, %v2502_v34  ;;  %vm1170_vm7 = vcmp.lt.s32.totalorder %v1154_v58, 288 }
 0x25b   : > { %744 = vmin.xlane.f32.xlu1 %v743_v48  ;;  %758 = vmin.xlane.f32.xlu0 %v757_v49  ;;  %v2522_v40 = vshll.u32 %v747_v35, 16  ;;  %vm1168_vm6 = vcmp.lt.s32.totalorder %v1152_v60, 288 }
 0x25c   : > { %v2454_v4 = vpop.xlane.xlu1 %768  ;;  %v2456_v5 = vpop.xlane.xlu0 %782 }
 0x25d   : > { %vm770_vm10 = vcmp.eq.f32.partialorder %v2355_v0, %v2454_v4  ;;  %vm784_vm11 = vcmp.eq.f32.partialorder %v2357_v1, %v2456_v5  ;;  %v775_v42 = vcvt.f32.s32 %v2454_v4 }
 0x25e   : > { %v771_v56 = vsel %vm770_vm10, %v766_v6, inf  ;;  %v785_v57 = vsel %vm784_vm11, %v780_v7, inf  ;;  %v1140_v7 = vadd.s32 48, %v2502_v34  ;;  %vm1172_vm11 = vcmp.lt.s32.totalorder %v1156_v11, 288 }
 0x25f   : > { %772 = vmin.xlane.f32.xlu1 %v771_v56  ;;  %786 = vmin.xlane.f32.xlu0 %v785_v57  ;;  %v2527_v51 = vshll.u32 %v775_v42, 16  ;;  %v1155_v57 = vadd.s32 %v2506_v33, %v1138_v62 }
 0x260   : > { %v2464_v12 = vpop.xlane.xlu1 %796  ;;  %v2466_v13 = vpop.xlane.xlu0 %810 }
 0x261   : > { %vm798_vm12 = vcmp.eq.f32.partialorder %v2371_v8, %v2464_v12  ;;  %vm812_vm13 = vcmp.eq.f32.partialorder %v2373_v9, %v2466_v13  ;;  %v803_v50 = vcvt.f32.s32 %v2464_v12  ;;  %v817_v48 = vcvt.f32.s32 %v2466_v13 }
 0x262   : > { %v799_v0 = vsel %vm798_vm12, %v794_v14, inf  ;;  %v813_v1 = vsel %vm812_vm13, %v808_v15, inf  ;;  %v2015_v14 = vmov 0.0   ;;  %vm1171_vm9 = vcmp.lt.s32.totalorder %v1155_v57, 288 }
 0x263   : > { %800 = vmin.xlane.f32.xlu1 %v799_v0  ;;  %814 = vmin.xlane.f32.xlu0 %v813_v1  ;;  %v2538_v4 = vshll.u32 %v803_v50, 16  ;;  %v2546_v3 = vshll.u32 %v817_v48, 16  ;;  %v2550_v15 = vsel %vm1167_vm5, 1.0, %v2015_v14  ;;  %v1142_v0 = vadd.s32 64, %v2502_v34 }
 0x264   : > { %v2474_v20 = vpop.xlane.xlu1 %824  ;;  %v2476_v21 = vpop.xlane.xlu0 %838  ;;  %v2590_v45 = vsel %vm1171_vm9, 1.0, %v2015_v14  ;;  %v2596_v37 = vsel %vm1172_vm11, 1.0, %v2015_v14 }
 0x265   : > { %vm826_vm14 = vcmp.eq.f32.partialorder %v2387_v16, %v2474_v20  ;;  %vm840_vm15 = vcmp.eq.f32.partialorder %v2389_v17, %v2476_v21  ;;  %v831_v49 = vcvt.f32.s32 %v2474_v20 }
 0x266   : > { %v827_v8 = vsel %vm826_vm14, %v822_v22, inf  ;;  %v841_v9 = vsel %vm840_vm15, %v836_v30, inf  ;;  %v2568_v22 = vsel %vm1168_vm6, 1.0, %v2015_v14  ;;  %v1157_v30 = vadd.s32 %v2506_v33, %v1140_v7 }
 0x267   : > { %828 = vmin.xlane.f32.xlu1 %v827_v8  ;;  %842 = vmin.xlane.f32.xlu0 %v841_v9  ;;  %v2553_v1 = vshll.u32 %v831_v49, 16  ;;  %v1158_v9 = vadd.s32 %v2506_v33, %v1141_v2 }
 0x268   : > { %v2483_v19 = vpop.xlane.xlu1 %852  ;;  %v2485_v32 = vpop.xlane.xlu0 %866  ;;  %vm1173_vm12 = vcmp.lt.s32.totalorder %v1157_v30, 288 }
 0x269   : > { %vm854_vm1 = vcmp.eq.f32.partialorder %v2402_v23, %v2483_v19  ;;  %vm868_vm2 = vcmp.eq.f32.partialorder %v2404_v24, %v2485_v32  ;;  %v691_v23 = vcvt.f32.s32 %v2424_v46  ;;  %v719_v24 = vcvt.f32.s32 %v2434_v52 }
 0x26a   : > { %v855_v16 = vsel %vm854_vm1, %v850_v25, inf  ;;  %v869_v17 = vsel %vm868_vm2, %v864_v36, inf  ;;  %v678_v46 = vshll.u32 %v677_v44, 16  ;;  %v789_v52 = vcvt.f32.s32 %v2456_v5 }
 0x26b   : > { %856 = vmin.xlane.f32.xlu1 %v855_v16  ;;  %870 = vmin.xlane.f32.xlu0 %v869_v17  ;;  %v2510_v43 = vshll.u32 %v691_v23, 16  ;;  %v2515_v53 = vshll.u32 %v719_v24, 16  ;;  %v845_v5 = vcvt.f32.s32 %v2476_v21  ;;  %v859_v6 = vcvt.f32.s32 %v2483_v19 }
 0x26c   : > { %v2491_v38 = vpop.xlane.xlu1 %880  ;;  %v2532_v63 = vshll.u32 %v789_v52, 16  ;;  %v873_v12 = vcvt.f32.s32 %v2485_v32  ;;  %v2575_v25 = vsel %vm1170_vm7, 1.0, %v2015_v14  ;;  %v1143_v36 = vadd.s32 72, %v2502_v34 }
 0x26d   : > { %vm882_vm3 = vcmp.eq.f32.partialorder %v2412_v31, %v2491_v38  ;;  %v761_v31 = vcvt.f32.s32 %v2446_v61  ;;  %v1136_v61 = vadd.s32 16, %v2502_v34  ;;  %v2562_v20 = vshll.u32 %v845_v5, 16 }
 0x26e   : > { %v883_v39 = vsel %vm882_vm3, %v878_v28, inf  ;;  %v2564_v21 = vshll.u32 %v859_v6, 16  ;;  %v2572_v18 = vshll.u32 %v873_v12, 16  ;;  %v1159_v16 = vadd.s32 %v2506_v33, %v1142_v0 }
 0x26f   : > { %884 = vmin.xlane.f32.xlu1 %v883_v39  ;;  %v2524_v41 = vshll.u32 %v761_v31, 16  ;;  %v1153_v56 = vadd.s32 %v2506_v33, %v1136_v61  ;;  %v887_v39 = vcvt.f32.s32 %v2491_v38  ;;  %v2016_v44 = vmov 1.0  }
 0x270   : > { %vm1174_vm13 = vcmp.lt.s32.totalorder %v1158_v9, 288  ;;  %vm1175_vm14 = vcmp.lt.s32.totalorder %v1159_v16, 288  ;;  %v1144_v52 = vadd.s32 80, %v2502_v34  ;;  %v2615_v60 = vsel %vm1173_vm12, 1.0, %v2015_v14 }
 0x271   : > { %vm1169_vm8 = vcmp.lt.s32.totalorder %v1153_v56, 288  ;;  %v2611_v50 = vsel %vm1174_vm13, 1.0, %v2015_v14  ;;  %v2624_v5 = vsel %vm1175_vm14, 1.0, %v2015_v14  ;;  %v1145_v6 = vadd.s32 88, %v2502_v34 }
 0x272   : > { %v2586_v23 = vsel %vm1169_vm8, 1.0, %v2015_v14  ;;  %v1161_v7 = vadd.s32 %v2506_v33, %v1144_v52  ;;  %v1146_v12 = vadd.s32 96, %v2502_v34 }
 0x274   : > { %vm1177_vm6 = vcmp.lt.s32.totalorder %v1161_v7, 288 }
 0x2dc   : > { %v675_v13 = vpop.xlane.xlu0 %674 }
 0x2dd   : > { %v676_v10 = vcvt.f32.s32 %v675_v13 }
 0x2df   : > { %v679_v8 = vadd.s32 %v678_v46, %v676_v10  ;;  %v1160_v46 = vadd.s32 %v2506_v33, %v1143_v36 }
 0x2e0   : > { %v689_v19 = vpop.xlane.xlu1 %688  ;;  %v703_v32 = vpop.xlane.xlu0 %702 }
 0x2e1   : > { %v690_v17 = vcvt.f32.s32 %v689_v19  ;;  %v704_v28 = vcvt.f32.s32 %v703_v32  ;;  %vm890_vm10 = vcmp.eq.s32.totalorder %v2285_v27, %v679_v8  ;;  %1100 = vst.msk [vmem:[%s2560_s12] sm:$0xff] %vm1099_vm4, %v679_v8  ;;  %vm1176_vm2 = vcmp.lt.s32.totalorder %v1160_v46, 288 }
 0x2e2   : > { %1753 = vmatprep.mubr.msk.f32.mxu1 %vm890_vm10, %v2016_v44  ;;  %v1548_v35 = vsel %vm890_vm10, 1.0, %v2015_v14  ;;  %v2645_v19 = vsel %vm1176_vm2, 1.0, %v2015_v14  ;;  %v1162_v32 = vadd.s32 %v2506_v33, %v1145_v6 }
 0x2e3   : > { %v693_v24 = vadd.s32 %v2510_v43, %v690_v17  ;;  %v707_v29 = vadd.s32 %v2512_v47, %v704_v28  ;;  %v1231_v47 = vmul.f32 %v2550_v15, %v1548_v35  ;;  %v2658_v28 = vadd.s32 %v2506_v33, %v1146_v12 }
 0x2e4   : > { %v717_v31 = vpop.xlane.xlu1 %716  ;;  %v731_v42 = vpop.xlane.xlu0 %730  ;;  %vm1178_vm9 = vcmp.lt.s32.totalorder %v1162_v32, 288 }
 0x2e5   : > { %1101 = vst.msk [vmem:[%s2560_s12 + $0x8] sm:$0xff] %vm1099_vm4, %v693_v24  ;;  %1102 = vst.msk [vmem:[%s2560_s12 + $0x10] sm:$0xff] %vm1099_vm4, %v707_v29  ;;  %v718_v43 = vcvt.f32.s32 %v717_v31  ;;  %v732_v54 = vcvt.f32.s32 %v731_v42  ;;  %vm891_vm15 = vcmp.eq.s32.totalorder %v2285_v27, %v693_v24  ;;  %vm892_vm1 = vcmp.eq.s32.totalorder %v2285_v27, %v707_v29 }
 0x2e6   : > { %v1549_v55 = vsel %vm891_vm15, 1.0, %v2015_v14  ;;  %1754 = vmatmul.mubr.msk.f32.vlgmr.msra.gmra.mrb[0].mxu1 %vm891_vm15, %v2016_v44  ;;  %v1550_v49 = vsel %vm892_vm1, 1.0, %v2015_v14  ;;  %vm1179_vm12 = vcmp.lt.s32.totalorder %v2658_v28, 288 }
 0x2e7   : > { %v721_v61 = vadd.s32 %v2515_v53, %v718_v43  ;;  %v735_v62 = vadd.s32 %v2517_v26, %v732_v54  ;;  %v1232_v48 = vmul.f32 %v2568_v22, %v1549_v55  ;;  %1756 = vmatprep.mubr.msk.f32.mxu1 %vm892_vm1, %v2016_v44  ;;  %v1233_v2 = vmul.f32 %v2586_v23, %v1550_v49 }
 0x2e8   : > { %v745_v58 = vpop.xlane.xlu1 %744  ;;  %v759_v59 = vpop.xlane.xlu0 %758  ;;  %v2667_v43 = vsel %vm1177_vm6, 1.0, %v2015_v14  ;;  %v1147_v54 = vadd.s32 104, %v2502_v34 }
 0x2e9   : > { %1103 = vst.msk [vmem:[%s2560_s12 + $0x18] sm:$0xff] %vm1099_vm4, %v721_v61  ;;  %1104 = vst.msk [vmem:[%s2560_s12 + $0x20] sm:$0xff] %vm1099_vm4, %v735_v62  ;;  %v1302_v53 = vadd.f32 %v1232_v48, %v1231_v47  ;;  %v746_v26 = vcvt.f32.s32 %v745_v58  ;;  %v760_v56 = vcvt.f32.s32 %v759_v59  ;;  %vm893_vm3 = vcmp.eq.s32.totalorder %v2285_v27, %v721_v61 }
 0x2ea   : > { %v1551_v57 = vsel %vm893_vm3, 1.0, %v2015_v14  ;;  %1757 = vmatmul.mubr.msk.f32.gmra.mrb[2].mxu1 %vm893_vm3, %v2016_v44  ;;  %vm894_vm5 = vcmp.eq.s32.totalorder %v2285_v27, %v735_v62 }
 0x2eb   : > { %v749_v13 = vadd.s32 %v2522_v40, %v746_v26  ;;  %v763_v0 = vadd.s32 %v2524_v41, %v760_v56  ;;  %v1552_v10 = vsel %vm894_vm5, 1.0, %v2015_v14  ;;  %1759 = vmatprep.mubr.msk.f32.mxu1 %vm894_vm5, %v2016_v44  ;;  %v1234_v11 = vmul.f32 %v2575_v25, %v1551_v57 }
 0x2ec   : > { %v773_v30 = vpop.xlane.xlu1 %772  ;;  %v787_v8 = vpop.xlane.xlu0 %786  ;;  %v1303_v9 = vadd.f32 %v1302_v53, %v1233_v2  ;;  %v1235_v16 = vmul.f32 %v2590_v45, %v1552_v10  ;;  %v1164_v53 = vadd.s32 %v2506_v33, %v1147_v54  ;;  %v1149_v26 = vadd.s32 120, %v2502_v34 }
 0x2ed   : > { %1105 = vst.msk [vmem:[%s2560_s12 + $0x28] sm:$0xff] %vm1099_vm4, %v749_v13  ;;  %1106 = vst.msk [vmem:[%s2560_s12 + $0x30] sm:$0xff] %vm1099_vm4, %v763_v0  ;;  %v774_v40 = vcvt.f32.s32 %v773_v30  ;;  %v788_v41 = vcvt.f32.s32 %v787_v8  ;;  %vm895_vm7 = vcmp.eq.s32.totalorder %v2285_v27, %v749_v13  ;;  %vm896_vm8 = vcmp.eq.s32.totalorder %v2285_v27, %v763_v0 }
 0x2ee   : > { %v1553_v36 = vsel %vm895_vm7, 1.0, %v2015_v14  ;;  %1760 = vmatmul.mubr.msk.f32.gmra.mrb[4].mxu1 %vm895_vm7, %v2016_v44  ;;  %v1304_v17 = vadd.f32 %v1303_v9, %v1234_v11  ;;  %v1554_v35 = vsel %vm896_vm8, 1.0, %v2015_v14  ;;  %v1148_v56 = vadd.s32 112, %v2502_v34 }
 0x2ef   : > { %v777_v24 = vadd.s32 %v2527_v51, %v774_v40  ;;  %v791_v29 = vadd.s32 %v2532_v63, %v788_v41  ;;  %1762 = vmatprep.mubr.msk.f32.mxu1 %vm896_vm8, %v2016_v44  ;;  %v1236_v31 = vmul.f32 %v2596_v37, %v1553_v36  ;;  %v1237_v55 = vmul.f32 %v2615_v60, %v1554_v35 }
 0x2f0   : > { %v801_v42 = vpop.xlane.xlu1 %800  ;;  %v815_v46 = vpop.xlane.xlu0 %814  ;;  %v1305_v52 = vadd.f32 %v1304_v17, %v1235_v16  ;;  %v2699_v34 = vsel %vm1178_vm9, 1.0, %v2015_v14  ;;  %vm1180_vm15 = vcmp.lt.s32.totalorder %v1164_v53, 288  ;;  %v1166_v40 = vadd.s32 %v2506_v33, %v1149_v26 }
 0x2f1   : > { %1107 = vst.msk [vmem:[%s2560_s12 + $0x38] sm:$0xff] %vm1099_vm4, %v777_v24  ;;  %1108 = vst.msk [vmem:[%s2560_s12 + $0x40] sm:$0xff] %vm1099_vm4, %v791_v29  ;;  %v802_v51 = vcvt.f32.s32 %v801_v42  ;;  %v816_v63 = vcvt.f32.s32 %v815_v46  ;;  %vm897_vm10 = vcmp.eq.s32.totalorder %v2285_v27, %v777_v24  ;;  %vm898_vm11 = vcmp.eq.s32.totalorder %v2285_v27, %v791_v29 }
 0x2f2   : > { %v1555_v47 = vsel %vm897_vm10, 1.0, %v2015_v14  ;;  %1763 = vmatmul.mubr.msk.f32.gmra.mrb[6].mxu1 %vm897_vm10, %v2016_v44  ;;  %v1306_v61 = vadd.f32 %v1305_v52, %v1236_v31  ;;  %v1556_v49 = vsel %vm898_vm11, 1.0, %v2015_v14  ;;  %v1165_v32 = vadd.s32 %v2506_v33, %v1148_v56 }
 0x2f3   : > { %v805_v62 = vadd.s32 %v2538_v4, %v802_v51  ;;  %v819_v48 = vadd.s32 %v2546_v3, %v816_v63  ;;  %1765 = vmatprep.mubr.msk.f32.mxu1 %vm898_vm11, %v2016_v44  ;;  %v1238_v58 = vmul.f32 %v2611_v50, %v1555_v47  ;;  %v1239_v2 = vmul.f32 %v2624_v5, %v1556_v49 }
 0x2f4   : > { %v829_v59 = vpop.xlane.xlu1 %828  ;;  %v843_v6 = vpop.xlane.xlu0 %842  ;;  %v1307_v7 = vadd.f32 %v1306_v61, %v1237_v55  ;;  %v2720_v33 = vsel %vm1179_vm12, 1.0, %v2015_v14  ;;  %v888_v31 = vshll.u32 %v887_v39, 16  ;;  %v2731_v28 = vsel %vm1180_vm15, 1.0, %v2015_v14 }
 0x2f5   : > { %1109 = vst.msk [vmem:[%s2560_s12 + $0x48] sm:$0xff] %vm1099_vm4, %v805_v62  ;;  %1110 = vst.msk [vmem:[%s2560_s12 + $0x50] sm:$0xff] %vm1099_vm4, %v819_v48  ;;  %v830_v4 = vcvt.f32.s32 %v829_v59  ;;  %v844_v3 = vcvt.f32.s32 %v843_v6  ;;  %vm899_vm13 = vcmp.eq.s32.totalorder %v2285_v27, %v805_v62  ;;  %vm900_vm14 = vcmp.eq.s32.totalorder %v2285_v27, %v819_v48 }
 0x2f6   : > { %v1557_v57 = vsel %vm899_vm13, 1.0, %v2015_v14  ;;  %1766 = vmatmul.mubr.msk.f32.gmra.mrb[8].mxu1 %vm899_vm13, %v2016_v44  ;;  %v1308_v12 = vadd.f32 %v1307_v7, %v1238_v58  ;;  %v1558_v10 = vsel %vm900_vm14, 1.0, %v2015_v14  ;;  %vm1181_vm3 = vcmp.lt.s32.totalorder %v1165_v32, 288 }
 0x2f7   : > { %v833_v13 = vadd.s32 %v2553_v1, %v830_v4  ;;  %v847_v0 = vadd.s32 %v2562_v20, %v844_v3  ;;  %1768 = vmatprep.mubr.msk.f32.mxu1 %vm900_vm14, %v2016_v44  ;;  %v1240_v11 = vmul.f32 %v2645_v19, %v1557_v57  ;;  %v1241_v36 = vmul.f32 %v2667_v43, %v1558_v10 }
 0x2f8   : > { %v857_v30 = vpop.xlane.xlu1 %856  ;;  %v871_v8 = vpop.xlane.xlu0 %870  ;;  %v1309_v9 = vadd.f32 %v1308_v12, %v1239_v2  ;;  %vm1182_vm7 = vcmp.lt.s32.totalorder %v1166_v40, 288  ;;  %v2746_v63 = vsel %vm1181_vm3, 1.0, %v2015_v14 }
 0x2f9   : > { %1111 = vst.msk [vmem:[%s2560_s12 + $0x58] sm:$0xff] %vm1099_vm4, %v833_v13  ;;  %1112 = vst.msk [vmem:[%s2560_s12 + $0x60] sm:$0xff] %vm1099_vm4, %v847_v0  ;;  %v858_v1 = vcvt.f32.s32 %v857_v30  ;;  %v872_v20 = vcvt.f32.s32 %v871_v8  ;;  %vm901_vm1 = vcmp.eq.s32.totalorder %v2285_v27, %v833_v13  ;;  %vm902_vm2 = vcmp.eq.s32.totalorder %v2285_v27, %v847_v0 }
 0x2fa   : > { %v1559_v41 = vsel %vm901_vm1, 1.0, %v2015_v14  ;;  %1769 = vmatmul.mubr.msk.f32.gmra.mrb[10].mxu1 %vm901_vm1, %v2016_v44  ;;  %v1310_v16 = vadd.f32 %v1309_v9, %v1240_v11  ;;  %v1560_v29 = vsel %vm902_vm2, 1.0, %v2015_v14  ;;  %v2749_v55 = vsel %vm1182_vm7, 1.0, %v2015_v14 }
 0x2fb   : > { %v861_v17 = vadd.s32 %v2564_v21, %v858_v1  ;;  %v875_v24 = vadd.s32 %v2572_v18, %v872_v20  ;;  %1771 = vmatprep.mubr.msk.f32.mxu1 %vm902_vm2, %v2016_v44  ;;  %v1242_v35 = vmul.f32 %v2699_v34, %v1559_v41  ;;  %v1243_v18 = vmul.f32 %v2720_v33, %v1560_v29 }
 0x2fc   : > { %v885_v42 = vpop.xlane.xlu1 %884  ;;  %v1311_v46 = vadd.f32 %v1310_v16, %v1241_v36 }
 0x2fd   : > { %1113 = vst.msk [vmem:[%s2560_s12 + $0x68] sm:$0xff] %vm1099_vm4, %v861_v17  ;;  %1114 = vst.msk [vmem:[%s2560_s12 + $0x70] sm:$0xff] %vm1099_vm4, %v875_v24  ;;  %v886_v21 = vcvt.f32.s32 %v885_v42  ;;  %vm903_vm5 = vcmp.eq.s32.totalorder %v2285_v27, %v861_v17  ;;  %vm904_vm6 = vcmp.eq.s32.totalorder %v2285_v27, %v875_v24 }
 0x2fe   : > { %v1561_v38 = vsel %vm903_vm5, 1.0, %v2015_v14  ;;  %1772 = vmatmul.mubr.msk.f32.gmra.mrb[12].mxu1 %vm903_vm5, %v2016_v44  ;;  %v1312_v39 = vadd.f32 %v1311_v46, %v1242_v35  ;;  %v1562_v54 = vsel %vm904_vm6, 1.0, %v2015_v14 }
 0x2ff   : > { %v889_v52 = vadd.s32 %v888_v31, %v886_v21  ;;  %1774 = vmatprep.mubr.msk.f32.mxu1 %vm904_vm6, %v2016_v44  ;;  %v1244_v51 = vmul.f32 %v2731_v28, %v1561_v38  ;;  %v1245_v62 = vmul.f32 %v2746_v63, %v1562_v54 }
 0x300   : > { %v1313_v47 = vadd.f32 %v1312_v39, %v1243_v18 }
 0x301   : > { %1115 = vst.msk [vmem:[%s2560_s12 + $0x78] sm:$0xff] %vm1099_vm4, %v889_v52  ;;  %vm905_vm8 = vcmp.eq.s32.totalorder %v2285_v27, %v889_v52 }
 0x302   : > { %v1563_v61 = vsel %vm905_vm8, 1.0, %v2015_v14  ;;  %1775 = vmatmul.mubr.msk.f32.gmra.mrb[14].mxu1 %vm905_vm8, %v2016_v44  ;;  %v1314_v48 = vadd.f32 %v1313_v47, %v1244_v51 }
 0x303   : > { %v1246_v49 = vmul.f32 %v2749_v55, %v1563_v61 }
 0x304   : > { %v1315_v58 = vadd.f32 %v1314_v48, %v1245_v62 }
 0x306   : > { %v1316_v59 = vadd.f32 %v1315_v58, %v1246_v49 }
 0x308   : > { %v1317_v6 = vrot.slane %v1316_v59, 4 }
 0x30a   : > { %v1318_v7 = vadd.f32 %v1317_v6, %v1316_v59 }
 0x30c   : > { %v1319_v53 = vrot.slane %v1318_v7, 2 }
 0x30e   : > { %v1320_v27 = vadd.f32 %v1319_v53, %v1318_v7 }
 0x310   : > { %v1321_v14 = vrot.slane %v1320_v27, 1 }
 0x312   : > { %v1322_v26 = vadd.f32 %v1321_v14, %v1320_v27 }
 0x314   : > { %1323 = vst [vmem:[%s268_s14] sm:$0x1] %v1322_v26 }
 0x315   : > { %1932 = shalt.err (!%p1929_p3)
}
 0x316   : > { %s1933_s10 = scalar_lea.hbm %s2766_s18, 16  ;;  %s1937_s16 = scalar_lea.hbm %s2926_s6, 48 }
 0x317   : > { %p1934_p4 = scmp.ne.s32.totalorder %s2766_s18, %s1933_s10  ;;  %p1938_p9 = scmp.lt.u32.totalorder %s2766_s18, %s2926_s6 }
 0x318   : > { %p1939_p10 = scmp.lt.u32.totalorder %s1937_s16, %s1933_s10  ;;  %p1941_p12 = scmp.lt.u32.totalorder %s1933_s10, %s2766_s18 }
 0x319   : > { %p1935_p7 = pnand %p1934_p4, %p2092_p5 }
 0x31a   : > { %p1940_p11 = por %p1939_p10, %p1938_p9 }
 0x31b   : > { %p1936_p8 = pneg %p1935_p7 }
 0x31c   : > { %p1942_p13 = por %p1941_p12, %p1940_p11 }
 0x31e   : > { %p1943_p0 = pnand %p1942_p13, %p1936_p8 }
 0x320   : > { %1946 = shalt.err (!%p1943_p0)
}
 0x321   : > { %1858 = dma.vmem_to_hbm [thread:$0]  (%p2092_p5), %s1373_s19, 16, %s2766_s18, %s1339_s20   ;;  %v1903_v56 = vld [vmem:[%s2143_s11 + $0x8] sm:$0xff]  ;;  %v1904_v57 = vld [vmem:[%s2143_s11] sm:$0xff]  ;;  %v1905_v11 = vld [vmem:[%s2143_s11 + $0x18] sm:$0xff]  ;;  %vm1300_vm4 = vcmask 253952  }
 0x322   : > { %s2790_s25 = scalar_lea.vmem %s2923_s3, %s2137_s29  ;;  %v1906_v40 = vld [vmem:[%s2143_s11 + $0x10] sm:$0xff]  ;;  %v1907_v16 = vld [vmem:[%s2143_s11 + $0x28] sm:$0xff]  ;;  %v1909_v18 = vld [vmem:[%s2143_s11 + $0x38] sm:$0xff]  ;;  %s262_s29 = scalar_lea.vmem [#allocation2], %s2759_s13 }
 0x323   : > { %v1911_v6 = vld [vmem:[%s2143_s11 + $0x48] sm:$0xff]  ;;  %s2877_s20 = scalar_lea.hbm %s2925_s5, %s2112_s15  ;;  %s1335_s10 = scalar_lea.sflag [#allocation3], %s2759_s13 }
 0x324   : > { %s2018_s14 = smov [#allocation2]  }
 0x325   : > { %s1951_s16 = sshll.u32 %s2018_s14, 4  ;;  %s1952_s16 = int_to_ptr.vmem [resolvable:$false] %s1951_s16 }
 0x326   : > { %s1953_s17 = scalar_lea.vmem %s1952_s16, 32 }
 0x3b9   : > { %v1755_v44 = vpop.f32.mrb[0].mxu1 }
 0x3ba   : > { %1084 = vst.msk [vmem:[%s2790_s25 + $0x8] sm:$0xff] %vm320_vm0, %v1755_v44  ;;  %v1117_v4 = vsub.f32 %v1755_v44, %v1903_v56  ;;  %v1004_v3 = vpop.f32.mrb[1].mxu1 }
 0x3bb   : > { %1083 = vst.msk [vmem:[%s2790_s25] sm:$0xff] %vm320_vm0, %v1004_v3  ;;  %v1116_v2 = vsub.f32 %v1004_v3, %v1904_v57 }
 0x3bc   : > { %v1216_v12 = vmul.f32 %v2568_v22, %v1117_v4 }
 0x3bd   : > { %v1215_v13 = vmul.f32 %v2550_v15, %v1116_v2  ;;  %v1758_v0 = vpop.f32.mrb[2].mxu1 }
 0x3be   : > { %v1248_v10 = vmul.f32 %v1216_v12, %v1216_v12  ;;  %1086 = vst.msk [vmem:[%s2790_s25 + $0x18] sm:$0xff] %vm320_vm0, %v1758_v0  ;;  %v1119_v30 = vsub.f32 %v1758_v0, %v1905_v11  ;;  %v1014_v8 = vpop.f32.mrb[3].mxu1  ;;  %v1913_v12 = vld [vmem:[%s2143_s11 + $0x58] sm:$0xff] }
 0x3bf   : > { %v1247_v9 = vmul.f32 %v1215_v13, %v1215_v13  ;;  %1085 = vst.msk [vmem:[%s2790_s25 + $0x10] sm:$0xff] %vm320_vm0, %v1014_v8  ;;  %v1118_v32 = vsub.f32 %v1014_v8, %v1906_v40 }
 0x3c0   : > { %v1264_v22 = vsel %vm320_vm0, %v1248_v10, 0.0  ;;  %v1218_v15 = vmul.f32 %v2575_v25, %v1119_v30  ;;  %v1908_v25 = vld [vmem:[%s2143_s11 + $0x20] sm:$0xff] }
 0x3c1   : > { %v1263_v1 = vsel %vm320_vm0, %v1247_v9, 0.0  ;;  %v1217_v20 = vmul.f32 %v2586_v23, %v1118_v32  ;;  %v1761_v41 = vpop.f32.mrb[4].mxu1 }
 0x3c2   : > { %v1265_v36 = vadd.f32 %v1264_v22, %v1263_v1  ;;  %1088 = vst.msk [vmem:[%s2790_s25 + $0x28] sm:$0xff] %vm320_vm0, %v1761_v41  ;;  %v1121_v17 = vsub.f32 %v1761_v41, %v1907_v16  ;;  %v1024_v24 = vpop.f32.mrb[5].mxu1  ;;  %v1250_v29 = vmul.f32 %v1218_v15, %v1218_v15  ;;  %v1915_v1 = vld [vmem:[%s2143_s11 + $0x68] sm:$0xff] }
 0x3c3   : > { %v1249_v35 = vmul.f32 %v1217_v20, %v1217_v20  ;;  %1087 = vst.msk [vmem:[%s2790_s25 + $0x20] sm:$0xff] %vm320_vm0, %v1024_v24  ;;  %v1120_v31 = vsub.f32 %v1024_v24, %v1908_v25 }
 0x3c4   : > { %v1220_v42 = vmul.f32 %v2596_v37, %v1121_v17  ;;  %v1268_v54 = vsel %vm320_vm0, %v1250_v29, 0.0  ;;  %v1910_v37 = vld [vmem:[%s2143_s11 + $0x30] sm:$0xff] }
 0x3c5   : > { %v1266_v23 = vsel %vm320_vm0, %v1249_v35, 0.0  ;;  %v1219_v46 = vmul.f32 %v2590_v45, %v1120_v31  ;;  %v1764_v21 = vpop.f32.mrb[6].mxu1 }
 0x3c6   : > { %v1267_v38 = vadd.f32 %v1266_v23, %v1265_v36  ;;  %1090 = vst.msk [vmem:[%s2790_s25 + $0x38] sm:$0xff] %vm320_vm0, %v1764_v21  ;;  %v1123_v39 = vsub.f32 %v1764_v21, %v1909_v18  ;;  %v1034_v52 = vpop.f32.mrb[7].mxu1  ;;  %v1252_v51 = vmul.f32 %v1220_v42, %v1220_v42  ;;  %v1917_v23 = vld [vmem:[%s2143_s11 + $0x78] sm:$0xff] }
 0x3c7   : > { %v1251_v47 = vmul.f32 %v1219_v46, %v1219_v46  ;;  %1089 = vst.msk [vmem:[%s2790_s25 + $0x30] sm:$0xff] %vm320_vm0, %v1034_v52  ;;  %v1122_v61 = vsub.f32 %v1034_v52, %v1910_v37  ;;  %v1918_v52 = vld [vmem:[%s2143_s11 + $0x70] sm:$0xff] }
 0x3c8   : > { %v1269_v45 = vadd.f32 %v1268_v54, %v1267_v38  ;;  %v1222_v62 = vmul.f32 %v2611_v50, %v1123_v39  ;;  %v1272_v27 = vsel %vm320_vm0, %v1252_v51, 0.0  ;;  %v1912_v50 = vld [vmem:[%s2143_s11 + $0x40] sm:$0xff] }
 0x3c9   : > { %v1270_v48 = vsel %vm320_vm0, %v1251_v47, 0.0  ;;  %v1221_v49 = vmul.f32 %v2615_v60, %v1122_v61  ;;  %v1767_v58 = vpop.f32.mrb[8].mxu1 }
 0x3ca   : > { %v1271_v59 = vadd.f32 %v1270_v48, %v1269_v45  ;;  %1092 = vst.msk [vmem:[%s2790_s25 + $0x48] sm:$0xff] %vm320_vm0, %v1767_v58  ;;  %v1125_v7 = vsub.f32 %v1767_v58, %v1911_v6  ;;  %v1044_v53 = vpop.f32.mrb[9].mxu1  ;;  %v1254_v14 = vmul.f32 %v1222_v62, %v1222_v62 }
 0x3cb   : > { %v1253_v26 = vmul.f32 %v1221_v49, %v1221_v49  ;;  %1091 = vst.msk [vmem:[%s2790_s25 + $0x40] sm:$0xff] %vm320_vm0, %v1044_v53  ;;  %v1124_v44 = vsub.f32 %v1044_v53, %v1912_v50 }
 0x3cc   : > { %v1273_v60 = vadd.f32 %v1272_v27, %v1271_v59  ;;  %v1224_v56 = vmul.f32 %v2645_v19, %v1125_v7  ;;  %v1276_v10 = vsel %vm320_vm0, %v1254_v14, 0.0  ;;  %v1914_v19 = vld [vmem:[%s2143_s11 + $0x50] sm:$0xff] }
 0x3cd   : > { %v1274_v4 = vsel %vm320_vm0, %v1253_v26, 0.0  ;;  %v1223_v3 = vmul.f32 %v2624_v5, %v1124_v44  ;;  %v1770_v57 = vpop.f32.mrb[10].mxu1 }
 0x3ce   : > { %v1275_v2 = vadd.f32 %v1274_v4, %v1273_v60  ;;  %1094 = vst.msk [vmem:[%s2790_s25 + $0x58] sm:$0xff] %vm320_vm0, %v1770_v57  ;;  %v1127_v13 = vsub.f32 %v1770_v57, %v1913_v12  ;;  %v1054_v0 = vpop.f32.mrb[11].mxu1  ;;  %v1256_v11 = vmul.f32 %v1224_v56, %v1224_v56 }
 0x3cf   : > { %v1255_v30 = vmul.f32 %v1223_v3, %v1223_v3  ;;  %1093 = vst.msk [vmem:[%s2790_s25 + $0x50] sm:$0xff] %vm320_vm0, %v1054_v0  ;;  %v1126_v8 = vsub.f32 %v1054_v0, %v1914_v19 }
 0x3d0   : > { %v1277_v5 = vadd.f32 %v1276_v10, %v1275_v2  ;;  %v1226_v9 = vmul.f32 %v2699_v34, %v1127_v13  ;;  %v1280_v36 = vsel %vm320_vm0, %v1256_v11, 0.0  ;;  %v1916_v34 = vld [vmem:[%s2143_s11 + $0x60] sm:$0xff]  ;;  %s1359_s11 = sshll.u32 %s262_s29, 4  ;;  %s2879_s11 = int_to_ptr.vmem [resolvable:$true] %s1359_s11 }
 0x3d1   : > { %v1278_v40 = vsel %vm320_vm0, %v1255_v30, 0.0  ;;  %v1225_v32 = vmul.f32 %v2667_v43, %v1126_v8  ;;  %v1773_v22 = vpop.f32.mrb[12].mxu1  ;;  %s1947_s12 = scalar_lea.vmem %s2879_s11, 16  ;;  %p1954_p4 = scmp.lt.s32.totalorder %s2879_s11, %s1952_s16 }
 0x3d2   : > { %v1279_v15 = vadd.f32 %v1278_v40, %v1277_v5  ;;  %1096 = vst.msk [vmem:[%s2790_s25 + $0x68] sm:$0xff] %vm320_vm0, %v1773_v22  ;;  %v1129_v20 = vsub.f32 %v1773_v22, %v1915_v1  ;;  %v1064_v41 = vpop.f32.mrb[13].mxu1  ;;  %v1258_v16 = vmul.f32 %v1226_v9, %v1226_v9  ;;  %p1948_p1 = scmp.ne.s32.totalorder %s2879_s11, %s1947_s12  ;;  %p1955_p7 = scmp.lt.s32.totalorder %s1953_s17, %s1947_s12 }
 0x3d3   : > { %v1257_v17 = vmul.f32 %v1225_v32, %v1225_v32  ;;  %1095 = vst.msk [vmem:[%s2790_s25 + $0x60] sm:$0xff] %vm320_vm0, %v1064_v41  ;;  %v1128_v24 = vsub.f32 %v1064_v41, %v1916_v34 }
 0x3d4   : > { %v1281_v43 = vadd.f32 %v1280_v36, %v1279_v15  ;;  %v1228_v29 = vmul.f32 %v2731_v28, %v1129_v20  ;;  %v1284_v38 = vsel %vm320_vm0, %v1258_v16, 0.0  ;;  %p1949_p2 = pnand %p1948_p1, %p2092_p5  ;;  %p1956_p8 = por %p1955_p7, %p1954_p4 }
 0x3d5   : > { %v1282_v35 = vsel %vm320_vm0, %v1257_v17, 0.0  ;;  %v1227_v25 = vmul.f32 %v2720_v33, %v1128_v24  ;;  %v1776_v31 = vpop.f32.mrb[14].mxu1 }
 0x3d6   : > { %v1283_v42 = vadd.f32 %v1282_v35, %v1281_v43  ;;  %1098 = vst.msk [vmem:[%s2790_s25 + $0x78] sm:$0xff] %vm320_vm0, %v1776_v31  ;;  %v1131_v46 = vsub.f32 %v1776_v31, %v1917_v23  ;;  %v1074_v21 = vpop.f32.mrb[15].mxu1  ;;  %v1260_v18 = vmul.f32 %v1228_v29, %v1228_v29  ;;  %p1950_p3 = pneg %p1949_p2 }
 0x3d7   : > { %v1259_v39 = vmul.f32 %v1227_v25, %v1227_v25  ;;  %1097 = vst.msk [vmem:[%s2790_s25 + $0x70] sm:$0xff] %vm320_vm0, %v1074_v21  ;;  %v1130_v54 = vsub.f32 %v1074_v21, %v1918_v52 }
 0x3d8   : > { %v1285_v28 = vadd.f32 %v1284_v38, %v1283_v42  ;;  %v1230_v51 = vmul.f32 %v2749_v55, %v1131_v46  ;;  %v1288_v61 = vsel %vm320_vm0, %v1260_v18, 0.0  ;;  %p1957_p9 = pnand %p1956_p8, %p1950_p3 }
 0x3d9   : > { %v1286_v33 = vsel %vm320_vm0, %v1259_v39, 0.0  ;;  %v1229_v47 = vmul.f32 %v2746_v63, %v1130_v54 }
 0x3da   : > { %v1287_v37 = vadd.f32 %v1286_v33, %v1285_v28  ;;  %v1262_v45 = vmul.f32 %v1230_v51, %v1230_v51 }
 0x3db   : > { %v1261_v62 = vmul.f32 %v1229_v47, %v1229_v47 }
 0x3dc   : > { %v1289_v48 = vadd.f32 %v1288_v61, %v1287_v37  ;;  %v1292_v59 = vsel %vm320_vm0, %v1262_v45, 0.0 }
 0x3dd   : > { %v1290_v49 = vsel %vm320_vm0, %v1261_v62, 0.0 }
 0x3de   : > { %v1291_v58 = vadd.f32 %v1290_v49, %v1289_v48 }
 0x3e0   : > { %v1293_v6 = vadd.f32 %v1292_v59, %v1291_v58 }
 0x3e2   : > { %v1294_v55 = vrot.slane %v1293_v6, 4 }
 0x3e4   : > { %v1295_v7 = vadd.f32 %v1294_v55, %v1293_v6 }
 0x3e6   : > { %v1296_v53 = vrot.slane %v1295_v7, 2 }
 0x3e8   : > { %v1297_v27 = vadd.f32 %v1296_v53, %v1295_v7 }
 0x3ea   : > { %v1298_v63 = vrot.slane %v1297_v27, 1 }
 0x3ec   : > { %v1299_v14 = vadd.f32 %v1298_v63, %v1297_v27 }
 0x3ee   : > { %1301 = vst.msk [vmem:[%s262_s29] sm:$0x1] %vm1300_vm4, %v1299_v14 }
 0x3ef   : > { %1960 = shalt.err (!%p1957_p9)
}
 0x3f0   : > { %s1961_s15 = scalar_lea.hbm %s2877_s20, 16  ;;  %s1965_s26 = scalar_lea.hbm %s2925_s5, 48 }
 0x3f1   : > { %p1962_p10 = scmp.ne.s32.totalorder %s2877_s20, %s1961_s15  ;;  %p1966_p13 = scmp.lt.u32.totalorder %s2877_s20, %s2925_s5 }
 0x3f2   : > { %p1967_p0 = scmp.lt.u32.totalorder %s1965_s26, %s1961_s15  ;;  %p1969_p2 = scmp.lt.u32.totalorder %s1961_s15, %s2877_s20 }
 0x3f3   : > { %p1963_p11 = pnand %p1962_p10, %p2092_p5 }
 0x3f4   : > { %p1968_p1 = por %p1967_p0, %p1966_p13 }
 0x3f5   : > { %p1964_p12 = pneg %p1963_p11 }
 0x3f6   : > { %p1970_p3 = por %p1969_p2, %p1968_p1 }
 0x3f8   : > { %p1971_p4 = pnand %p1970_p3, %p1964_p12 }
 0x3fa   : > { %1974 = shalt.err (!%p1971_p4)
}
 0x3fb   : > { %1857 = dma.vmem_to_hbm [thread:$0]  (%p2092_p5), %s2879_s11, 16, %s2877_s20, %s1335_s10  }
 0x3fc PF: > { %p1868_p7 = scmp.ge.s32.totalorder %s2013_s24, 2  ;;  %s1400_s29 = sand.u32 1, %s2001_s21  }
 0x3fd   : > { %s1401_s18 = scalar_lea.sflag [#allocation3], %s1400_s29 }
 0x3fe   : > { %p1862_p8 = pnand %p1868_p7, %p2096_p6 }
 0x400   : > { %1992 = dma.done.wait (!%p1862_p8), %s1401_s18, 16  }
 0x401   : > { %1994 = vsyncadd (!%p1862_p8), %s1401_s18, 4294967280  ;;  %s1409_s19 = scalar_lea.sflag [#allocation5], %s1400_s29 }
 0x402   : > { %1996 = dma.done.wait (!%p1862_p8), %s1409_s19, 16  }
 0x403   : > { %1998 = vsyncadd (!%p1862_p8), %s1409_s19, 4294967280  ;;  %p20_p5 = scmp.ge.s32.totalorder %s2079_s27, 5   ;;  %s2931_s21 = smov %s2005_s22 }
 0x404   : > { %s2932_s22 = smov %s2009_s23  ;;  %s2933_s23 = smov %s2090_s30 }
 0x405   : > { %s2934_s24 = smov %s2079_s27  ;;  %22 = sbr.rel (!%p20_p5) target bundleno = 5 (0x5), region = 108 }
 0x40c   :  { %1413 = vsyncpa [#allocation3], 1 }
 0x40d   :  { %1415 = vsyncpa [#allocation3 + $0x1], 1 }
 0x40e   :  { %1416 = vsyncpa [#allocation5], 1 }
 0x40f   :  { %1418 = vsyncpa [#allocation5 + $0x1], 1 }

</bundles_post_ra>
